<compile_context>
chip_gen: v6e
topology: v6e:2x2x1
jax: 0.10.0
libtpu: 0.0.40
codegen_flags: <defaults>
</compile_context>

<pallas_src>
import jax
import jax.numpy as jnp
from jax.experimental import pallas as pl
from jax.experimental.pallas import tpu as pltpu

C = 23          # channels fixed by the module definition
CP = 24         # channels padded to a sublane multiple (8)
KH = KW = 3     # conv kernel size
EPS = 1e-5      # nn.BatchNorm2d default eps
GUARD = 128     # zero guard band (lanes) on each end of the slab (>= wp+1 required)


# ---------------------------------------------------------------------------
# Fused Pallas kernel
# ---------------------------------------------------------------------------
def _fused_resblock_call(xslab, mask, w1p, w2p, pp, *, n, h, w):
    """conv1+BN1+ReLU -> conv2+BN2+residual+ReLU, all in one pallas_call."""
    cp, l_tot = xslab.shape
    lc = mask.shape[1]                       # compute window width (multiple of 128)
    wp = w + 2
    # 3x3 tap offsets in the padded, flattened (n, h+2, w+2) lane axis.
    offsets = tuple((dy - 1) * wp + (dx - 1) for dy in range(KH) for dx in range(KW))
    inv_cnt = 1.0 / float(n * h * w)         # interior element count for BN stats

    def kernel(x_ref, m_ref, w1_ref, w2_ref, p_ref, o_ref, y1_ref):
        msk = m_ref[...]                     # (1, lc)  1.0 at interior positions
        par = p_ref[...]                     # (cp, 8)  packed per-channel params
        b1, g1, be1 = par[:, 0:1], par[:, 1:2], par[:, 2:3]
        b2, g2, be2 = par[:, 3:4], par[:, 4:5], par[:, 5:6]

        def conv(src_ref, w_ref, bias):
            # Unrolled per-tap accumulation; shift folded into the (static) slice.
            w_all = w_ref[...]               # (9, cp, cp), loaded once
            o0 = offsets[0]
            acc = bias + jnp.dot(w_all[0],
                                 src_ref[:, GUARD + o0:GUARD + o0 + lc],
                                 preferred_element_type=jnp.float32)
            for t in range(1, KH * KW):
                o = offsets[t]
                acc = acc + jnp.dot(w_all[t],
                                    src_ref[:, GUARD + o:GUARD + o + lc],
                                    preferred_element_type=jnp.float32)
            return acc

        def bn(y, g, beta):
            # Single-pass masked batch statistics, folded affine.
            ym = y * msk
            s1 = jnp.sum(ym, axis=1, keepdims=True)
            s2 = jnp.sum(ym * y, axis=1, keepdims=True)
            mean = s1 * inv_cnt
            var = s2 * inv_cnt - mean * mean
            scale = g * jax.lax.rsqrt(var + EPS)
            shift = beta - mean * scale
            return y * scale + shift

        # ---- stage 1: conv1 -> BN1 -> ReLU (masked -> zero padding ring for conv2)
        y1 = jnp.maximum(bn(conv(x_ref, w1_ref, b1), g1, be1), 0.0) * msk
        y1_ref[:, 0:GUARD] = jnp.zeros((cp, GUARD), jnp.float32)
        y1_ref[:, GUARD + lc:l_tot] = jnp.zeros((cp, l_tot - GUARD - lc), jnp.float32)
        y1_ref[:, GUARD:GUARD + lc] = y1

        # ---- stage 2: conv2 -> BN2 -> +residual -> ReLU
        y2 = bn(conv(y1_ref, w2_ref, b2), g2, be2)
        o_ref[...] = jnp.maximum(y2 + x_ref[:, GUARD:GUARD + lc], 0.0).astype(o_ref.dtype)

    return pl.pallas_call(
        kernel,
        out_shape=jax.ShapeDtypeStruct((cp, lc), jnp.float32),
        grid=(1,),
        in_specs=[
            pl.BlockSpec((cp, l_tot), lambda i: (0, 0)),          # padded slab (res.)
            pl.BlockSpec((1, lc), lambda i: (0, 0)),              # interior mask
            pl.BlockSpec((KH * KW, cp, cp), lambda i: (0, 0, 0)),  # W1 taps
            pl.BlockSpec((KH * KW, cp, cp), lambda i: (0, 0, 0)),  # W2 taps
            pl.BlockSpec((cp, 8), lambda i: (0, 0)),              # packed b/gamma/beta
        ],
        out_specs=pl.BlockSpec((cp, lc), lambda i: (0, 0)),
        scratch_shapes=[pltpu.VMEM((cp, l_tot), jnp.float32)],    # y1 stays in VMEM
        compiler_params=pltpu.CompilerParams(dimension_semantics=("arbitrary",)),
    )(xslab, mask, w1p, w2p, pp)


# ---------------------------------------------------------------------------
# Wrapper (pure layout glue, no im2col / no HBM intermediates)
# ---------------------------------------------------------------------------
@jax.jit
def res_block_forward(x_nchw, params):
    """Forward pass matching ResBlock.forward semantics. Input/output: NCHW f32."""
    n, c, h, w = x_nchw.shape
    hp, wp = h + 2, w + 2
    assert c == C and wp + 1 <= GUARD
    l_inner = n * hp * wp
    lc = ((l_inner + 127) // 128) * 128
    l_tot = GUARD + lc + GUARD

    # Channel-first slab: conv zero-padding ring baked in, channel dim padded 23->24,
    # lane axis wrapped in a 128-lane zero guard on both ends.
    xc = jnp.pad(jnp.transpose(x_nchw, (1, 0, 2, 3)),
                 ((0, CP - c), (0, 0), (1, 1), (1, 1)))             # (CP, N, Hp, Wp)
    xslab = jnp.pad(xc.reshape(CP, l_inner),
                    ((0, 0), (GUARD, l_tot - GUARD - l_inner)))     # (CP, L_tot)

    # 1.0 at interior (valid) positions of the compute window, 0.0 elsewhere.
    msk = jnp.pad(jnp.ones((n, h, w), jnp.float32), ((0, 0), (1, 1), (1, 1)))
    msk = jnp.pad(msk.reshape(1, l_inner), ((0, 0), (0, lc - l_inner)))

    # Weights HWIO -> (9, C_out, C_in), tap order dy-major matching the kernel offsets;
    # zero-padded to (9, CP, CP).
    def pack_w(wg):
        wt = jnp.transpose(wg, (0, 1, 3, 2)).reshape(KH * KW, c, c)
        return jnp.pad(wt, ((0, 0), (0, CP - c), (0, CP - c)))
    w1p, w2p = pack_w(params["w1"]), pack_w(params["w2"])

    # Pack per-channel vectors into one (CP, 8) array: [b1 g1 beta1 b2 g2 beta2 0 0].
    # Padded channel rows are all-zero (gamma=0 => its output is exactly 0).
    zeros = jnp.zeros((c,), jnp.float32)
    pp = jnp.stack([params["b1"], params["g1"], params["beta1"],
                    params["b2"], params["g2"], params["beta2"], zeros, zeros], axis=1)
    pp = jnp.pad(pp, ((0, CP - c), (0, 0)))

    out2d = _fused_resblock_call(xslab, msk, w1p, w2p, pp, n=n, h=h, w=w)

    out = out2d[:c, :l_inner].reshape(c, n, hp, wp)[:, :, 1:1 + h, 1:1 + w]
    return jnp.transpose(out, (1, 0, 2, 3))                        # -> NCHW


# ---------------------------------------------------------------------------
# Parameter init (mirrors module shapes; fresh BN: gamma=1, beta=0)
# ---------------------------------------------------------------------------
def init_params(key):
    k1, k2, k3, k4 = jax.random.split(key, 4)
    fan_in = C * KH * KW
    bound = 1.0 / (fan_in ** 0.5)
    w1 = jax.random.uniform(k1, (KH, KW, C, C), jnp.float32, -bound, bound)  # HWIO
    b1 = jax.random.uniform(k2, (C,), jnp.float32, -bound, bound)
    w2 = jax.random.uniform(k3, (KH, KW, C, C), jnp.float32, -bound, bound)  # HWIO
    b2 = jax.random.uniform(k4, (C,), jnp.float32, -bound, bound)
    return dict(
        w1=w1, b1=b1, g1=jnp.ones((C,), jnp.float32), beta1=jnp.zeros((C,), jnp.float32),
        w2=w2, b2=b2, g2=jnp.ones((C,), jnp.float32), beta2=jnp.zeros((C,), jnp.float32),
    )


# ---------------------------------------------------------------------------
# Pure-JAX reference (correctness check only)
# ---------------------------------------------------------------------------
def _ref_forward(x_nchw, params):
    x = jnp.transpose(x_nchw, (0, 2, 3, 1))

    def conv_bn(x, w, b, g, beta):
        y = jax.lax.conv_general_dilated(
            x, w, window_strides=(1, 1), padding="SAME",
            dimension_numbers=("NHWC", "HWIO", "NHWC")) + b
        mean = jnp.mean(y, axis=(0, 1, 2), keepdims=True)
        var = jnp.mean(jnp.square(y - mean), axis=(0, 1, 2), keepdims=True)
        return (y - mean) * jax.lax.rsqrt(var + EPS) * g + beta

    y = jax.nn.relu(conv_bn(x, params["w1"], params["b1"], params["g1"], params["beta1"]))
    y = conv_bn(y, params["w2"], params["b2"], params["g2"], params["beta2"]) + x
    return jnp.transpose(jax.nn.relu(y), (0, 3, 1, 2))


# ---------------------------------------------------------------------------
if __name__ == "__main__":
    key = jax.random.PRNGKey(0)
    kx, kp = jax.random.split(key)

    # Small shape consistent with the module: 23 channels, 8x8 board, batch 2.
    x = jax.random.normal(kx, (2, C, 8, 8), dtype=jnp.float32)
    params = init_params(kp)

    out = jax.block_until_ready(res_block_forward(x, params))

    ref = _ref_forward(x, params)
    assert out.shape == x.shape and out.dtype == jnp.float32
    assert jnp.allclose(out, ref, rtol=1e-4, atol=1e-4), "mismatch vs JAX reference"

    print("KERNEL_OK")
</pallas_src>

<mosaic_0001>
module attributes {stable_mosaic.version = 11 : i64} {
  func.func @kernel(%arg0: i32, %arg1: memref<24x512xf32, #tpu.memory_space<vmem>>, %arg2: memref<1x256xf32, #tpu.memory_space<vmem>>, %arg3: memref<9x24x24xf32, #tpu.memory_space<vmem>>, %arg4: memref<9x24x24xf32, #tpu.memory_space<vmem>>, %arg5: memref<24x8xf32, #tpu.memory_space<vmem>>, %arg6: memref<24x256xf32, #tpu.memory_space<vmem>>, %arg7: memref<24x512xf32, #tpu.memory_space<vmem>>) attributes {dimension_semantics = [#tpu.dimension_semantics<arbitrary>], iteration_bounds = array<i64: 1>, scalar_prefetch = 0 : i64, scratch_operands = 1 : i64, tpu.core_type = #tpu.core_type<tc>, window_params = [{pipeline_mode = #tpu.pipeline_mode<synchronous>, transform_indices = @transform_0, window_bounds = array<i64: 24, 512>}, {pipeline_mode = #tpu.pipeline_mode<synchronous>, transform_indices = @transform_1, window_bounds = array<i64: 1, 256>}, {pipeline_mode = #tpu.pipeline_mode<synchronous>, transform_indices = @transform_2, window_bounds = array<i64: 9, 24, 24>}, {pipeline_mode = #tpu.pipeline_mode<synchronous>, transform_indices = @transform_3, window_bounds = array<i64: 9, 24, 24>}, {pipeline_mode = #tpu.pipeline_mode<synchronous>, transform_indices = @transform_4, window_bounds = array<i64: 24, 8>}, {pipeline_mode = #tpu.pipeline_mode<synchronous>, transform_indices = @transform_5, window_bounds = array<i64: 24, 256>}]} {
    %c0 = arith.constant 0 : index
    %c0_0 = arith.constant 0 : index
    %0 = vector.load %arg2[%c0, %c0_0] : memref<1x256xf32, #tpu.memory_space<vmem>>, vector<1x256xf32>
    %c0_1 = arith.constant 0 : index
    %c0_2 = arith.constant 0 : index
    %1 = vector.load %arg5[%c0_1, %c0_2] : memref<24x8xf32, #tpu.memory_space<vmem>>, vector<24x8xf32>
    %2 = vector.extract_strided_slice %1 {offsets = [0, 0], sizes = [24, 1], strides = [1, 1]} : vector<24x8xf32> to vector<24x1xf32>
    %3 = vector.extract_strided_slice %1 {offsets = [0, 1], sizes = [24, 1], strides = [1, 1]} : vector<24x8xf32> to vector<24x1xf32>
    %4 = vector.extract_strided_slice %1 {offsets = [0, 2], sizes = [24, 1], strides = [1, 1]} : vector<24x8xf32> to vector<24x1xf32>
    %5 = vector.extract_strided_slice %1 {offsets = [0, 3], sizes = [24, 1], strides = [1, 1]} : vector<24x8xf32> to vector<24x1xf32>
    %6 = vector.extract_strided_slice %1 {offsets = [0, 4], sizes = [24, 1], strides = [1, 1]} : vector<24x8xf32> to vector<24x1xf32>
    %7 = vector.extract_strided_slice %1 {offsets = [0, 5], sizes = [24, 1], strides = [1, 1]} : vector<24x8xf32> to vector<24x1xf32>
    %c0_3 = arith.constant 0 : index
    %c0_4 = arith.constant 0 : index
    %c0_5 = arith.constant 0 : index
    %8 = vector.load %arg3[%c0_3, %c0_4, %c0_5] : memref<9x24x24xf32, #tpu.memory_space<vmem>>, vector<9x24x24xf32>
    %9 = vector.extract_strided_slice %8 {offsets = [0, 0, 0], sizes = [1, 24, 24], strides = [1, 1, 1]} : vector<9x24x24xf32> to vector<1x24x24xf32>
    %10 = vector.shape_cast %9 : vector<1x24x24xf32> to vector<24x24xf32>
    %c0_6 = arith.constant 0 : index
    %c117 = arith.constant 117 : index
    %11 = vector.load %arg1[%c0_6, %c117] : memref<24x512xf32, #tpu.memory_space<vmem>>, vector<24x256xf32>
    %cst = arith.constant dense<0.000000e+00> : vector<24x256xf32>
    %12 = tpu.matmul %10, %11, %cst {dimension_numbers = #tpu.dot_dimension_numbers<[1], [0], [0], [1], [0, 0, 1, 1], [], []>} : vector<24x24xf32>, vector<24x256xf32>, vector<24x256xf32> -> vector<24x256xf32>
    %13 = vector.broadcast %2 : vector<24x1xf32> to vector<24x256xf32>
    %14 = arith.addf %13, %12 : vector<24x256xf32>
    %15 = vector.extract_strided_slice %8 {offsets = [1, 0, 0], sizes = [1, 24, 24], strides = [1, 1, 1]} : vector<9x24x24xf32> to vector<1x24x24xf32>
    %16 = vector.shape_cast %15 : vector<1x24x24xf32> to vector<24x24xf32>
    %c0_7 = arith.constant 0 : index
    %c118 = arith.constant 118 : index
    %17 = vector.load %arg1[%c0_7, %c118] : memref<24x512xf32, #tpu.memory_space<vmem>>, vector<24x256xf32>
    %cst_8 = arith.constant dense<0.000000e+00> : vector<24x256xf32>
    %18 = tpu.matmul %16, %17, %cst_8 {dimension_numbers = #tpu.dot_dimension_numbers<[1], [0], [0], [1], [0, 0, 1, 1], [], []>} : vector<24x24xf32>, vector<24x256xf32>, vector<24x256xf32> -> vector<24x256xf32>
    %19 = arith.addf %14, %18 : vector<24x256xf32>
    %20 = vector.extract_strided_slice %8 {offsets = [2, 0, 0], sizes = [1, 24, 24], strides = [1, 1, 1]} : vector<9x24x24xf32> to vector<1x24x24xf32>
    %21 = vector.shape_cast %20 : vector<1x24x24xf32> to vector<24x24xf32>
    %c0_9 = arith.constant 0 : index
    %c119 = arith.constant 119 : index
    %22 = vector.load %arg1[%c0_9, %c119] : memref<24x512xf32, #tpu.memory_space<vmem>>, vector<24x256xf32>
    %cst_10 = arith.constant dense<0.000000e+00> : vector<24x256xf32>
    %23 = tpu.matmul %21, %22, %cst_10 {dimension_numbers = #tpu.dot_dimension_numbers<[1], [0], [0], [1], [0, 0, 1, 1], [], []>} : vector<24x24xf32>, vector<24x256xf32>, vector<24x256xf32> -> vector<24x256xf32>
    %24 = arith.addf %19, %23 : vector<24x256xf32>
    %25 = vector.extract_strided_slice %8 {offsets = [3, 0, 0], sizes = [1, 24, 24], strides = [1, 1, 1]} : vector<9x24x24xf32> to vector<1x24x24xf32>
    %26 = vector.shape_cast %25 : vector<1x24x24xf32> to vector<24x24xf32>
    %c0_11 = arith.constant 0 : index
    %c127 = arith.constant 127 : index
    %27 = vector.load %arg1[%c0_11, %c127] : memref<24x512xf32, #tpu.memory_space<vmem>>, vector<24x256xf32>
    %cst_12 = arith.constant dense<0.000000e+00> : vector<24x256xf32>
    %28 = tpu.matmul %26, %27, %cst_12 {dimension_numbers = #tpu.dot_dimension_numbers<[1], [0], [0], [1], [0, 0, 1, 1], [], []>} : vector<24x24xf32>, vector<24x256xf32>, vector<24x256xf32> -> vector<24x256xf32>
    %29 = arith.addf %24, %28 : vector<24x256xf32>
    %30 = vector.extract_strided_slice %8 {offsets = [4, 0, 0], sizes = [1, 24, 24], strides = [1, 1, 1]} : vector<9x24x24xf32> to vector<1x24x24xf32>
    %31 = vector.shape_cast %30 : vector<1x24x24xf32> to vector<24x24xf32>
    %c0_13 = arith.constant 0 : index
    %c128 = arith.constant 128 : index
    %32 = vector.load %arg1[%c0_13, %c128] : memref<24x512xf32, #tpu.memory_space<vmem>>, vector<24x256xf32>
    %cst_14 = arith.constant dense<0.000000e+00> : vector<24x256xf32>
    %33 = tpu.matmul %31, %32, %cst_14 {dimension_numbers = #tpu.dot_dimension_numbers<[1], [0], [0], [1], [0, 0, 1, 1], [], []>} : vector<24x24xf32>, vector<24x256xf32>, vector<24x256xf32> -> vector<24x256xf32>
    %34 = arith.addf %29, %33 : vector<24x256xf32>
    %35 = vector.extract_strided_slice %8 {offsets = [5, 0, 0], sizes = [1, 24, 24], strides = [1, 1, 1]} : vector<9x24x24xf32> to vector<1x24x24xf32>
    %36 = vector.shape_cast %35 : vector<1x24x24xf32> to vector<24x24xf32>
    %c0_15 = arith.constant 0 : index
    %c129 = arith.constant 129 : index
    %37 = vector.load %arg1[%c0_15, %c129] : memref<24x512xf32, #tpu.memory_space<vmem>>, vector<24x256xf32>
    %cst_16 = arith.constant dense<0.000000e+00> : vector<24x256xf32>
    %38 = tpu.matmul %36, %37, %cst_16 {dimension_numbers = #tpu.dot_dimension_numbers<[1], [0], [0], [1], [0, 0, 1, 1], [], []>} : vector<24x24xf32>, vector<24x256xf32>, vector<24x256xf32> -> vector<24x256xf32>
    %39 = arith.addf %34, %38 : vector<24x256xf32>
    %40 = vector.extract_strided_slice %8 {offsets = [6, 0, 0], sizes = [1, 24, 24], strides = [1, 1, 1]} : vector<9x24x24xf32> to vector<1x24x24xf32>
    %41 = vector.shape_cast %40 : vector<1x24x24xf32> to vector<24x24xf32>
    %c0_17 = arith.constant 0 : index
    %c137 = arith.constant 137 : index
    %42 = vector.load %arg1[%c0_17, %c137] : memref<24x512xf32, #tpu.memory_space<vmem>>, vector<24x256xf32>
    %cst_18 = arith.constant dense<0.000000e+00> : vector<24x256xf32>
    %43 = tpu.matmul %41, %42, %cst_18 {dimension_numbers = #tpu.dot_dimension_numbers<[1], [0], [0], [1], [0, 0, 1, 1], [], []>} : vector<24x24xf32>, vector<24x256xf32>, vector<24x256xf32> -> vector<24x256xf32>
    %44 = arith.addf %39, %43 : vector<24x256xf32>
    %45 = vector.extract_strided_slice %8 {offsets = [7, 0, 0], sizes = [1, 24, 24], strides = [1, 1, 1]} : vector<9x24x24xf32> to vector<1x24x24xf32>
    %46 = vector.shape_cast %45 : vector<1x24x24xf32> to vector<24x24xf32>
    %c0_19 = arith.constant 0 : index
    %c138 = arith.constant 138 : index
    %47 = vector.load %arg1[%c0_19, %c138] : memref<24x512xf32, #tpu.memory_space<vmem>>, vector<24x256xf32>
    %cst_20 = arith.constant dense<0.000000e+00> : vector<24x256xf32>
    %48 = tpu.matmul %46, %47, %cst_20 {dimension_numbers = #tpu.dot_dimension_numbers<[1], [0], [0], [1], [0, 0, 1, 1], [], []>} : vector<24x24xf32>, vector<24x256xf32>, vector<24x256xf32> -> vector<24x256xf32>
    %49 = arith.addf %44, %48 : vector<24x256xf32>
    %50 = vector.extract_strided_slice %8 {offsets = [8, 0, 0], sizes = [1, 24, 24], strides = [1, 1, 1]} : vector<9x24x24xf32> to vector<1x24x24xf32>
    %51 = vector.shape_cast %50 : vector<1x24x24xf32> to vector<24x24xf32>
    %c0_21 = arith.constant 0 : index
    %c139 = arith.constant 139 : index
    %52 = vector.load %arg1[%c0_21, %c139] : memref<24x512xf32, #tpu.memory_space<vmem>>, vector<24x256xf32>
    %cst_22 = arith.constant dense<0.000000e+00> : vector<24x256xf32>
    %53 = tpu.matmul %51, %52, %cst_22 {dimension_numbers = #tpu.dot_dimension_numbers<[1], [0], [0], [1], [0, 0, 1, 1], [], []>} : vector<24x24xf32>, vector<24x256xf32>, vector<24x256xf32> -> vector<24x256xf32>
    %54 = arith.addf %49, %53 : vector<24x256xf32>
    %55 = vector.broadcast %0 : vector<1x256xf32> to vector<24x256xf32>
    %56 = arith.mulf %54, %55 : vector<24x256xf32>
    %cst_23 = arith.constant dense<0.000000e+00> : vector<24xf32>
    %57 = vector.multi_reduction <add>, %56, %cst_23 [1] : vector<24x256xf32> to vector<24xf32>
    %58 = vector.shape_cast %57 : vector<24xf32> to vector<24x1xf32>
    %59 = arith.mulf %56, %54 : vector<24x256xf32>
    %cst_24 = arith.constant dense<0.000000e+00> : vector<24xf32>
    %60 = vector.multi_reduction <add>, %59, %cst_24 [1] : vector<24x256xf32> to vector<24xf32>
    %61 = vector.shape_cast %60 : vector<24xf32> to vector<24x1xf32>
    %cst_25 = arith.constant 7.812500e-03 : f32
    %62 = vector.broadcast %cst_25 : f32 to vector<24x1xf32>
    %63 = arith.mulf %58, %62 : vector<24x1xf32>
    %cst_26 = arith.constant 7.812500e-03 : f32
    %64 = vector.broadcast %cst_26 : f32 to vector<24x1xf32>
    %65 = arith.mulf %61, %64 : vector<24x1xf32>
    %66 = arith.mulf %63, %63 : vector<24x1xf32>
    %67 = arith.subf %65, %66 : vector<24x1xf32>
    %cst_27 = arith.constant 9.99999974E-6 : f32
    %68 = vector.broadcast %cst_27 : f32 to vector<24x1xf32>
    %69 = arith.addf %67, %68 : vector<24x1xf32>
    %70 = math.rsqrt %69 : vector<24x1xf32>
    %71 = arith.mulf %3, %70 : vector<24x1xf32>
    %72 = arith.mulf %63, %71 : vector<24x1xf32>
    %73 = arith.subf %4, %72 : vector<24x1xf32>
    %74 = vector.broadcast %71 : vector<24x1xf32> to vector<24x256xf32>
    %75 = arith.mulf %54, %74 : vector<24x256xf32>
    %76 = vector.broadcast %73 : vector<24x1xf32> to vector<24x256xf32>
    %77 = arith.addf %75, %76 : vector<24x256xf32>
    %cst_28 = arith.constant 0.000000e+00 : f32
    %78 = vector.broadcast %cst_28 : f32 to vector<24x256xf32>
    %79 = arith.maximumf %77, %78 : vector<24x256xf32>
    %80 = vector.broadcast %0 : vector<1x256xf32> to vector<24x256xf32>
    %81 = arith.mulf %79, %80 : vector<24x256xf32>
    %cst_29 = arith.constant 0.000000e+00 : f32
    %82 = vector.broadcast %cst_29 : f32 to vector<24x128xf32>
    %c0_30 = arith.constant 0 : index
    %c0_31 = arith.constant 0 : index
    %83 = vector.load %arg7[%c0_30, %c0_31] : memref<24x512xf32, #tpu.memory_space<vmem>>, vector<24x128xf32>
    tpu.vector_store %arg7[%c0_30, %c0_31], %82 {strides = array<i32>} : memref<24x512xf32, #tpu.memory_space<vmem>>, vector<24x128xf32>,
    %cst_32 = arith.constant 0.000000e+00 : f32
    %84 = vector.broadcast %cst_32 : f32 to vector<24x128xf32>
    %c0_33 = arith.constant 0 : index
    %c384 = arith.constant 384 : index
    %85 = vector.load %arg7[%c0_33, %c384] : memref<24x512xf32, #tpu.memory_space<vmem>>, vector<24x128xf32>
    tpu.vector_store %arg7[%c0_33, %c384], %84 {strides = array<i32>} : memref<24x512xf32, #tpu.memory_space<vmem>>, vector<24x128xf32>,
    %c0_34 = arith.constant 0 : index
    %c128_35 = arith.constant 128 : index
    %86 = vector.load %arg7[%c0_34, %c128_35] : memref<24x512xf32, #tpu.memory_space<vmem>>, vector<24x256xf32>
    tpu.vector_store %arg7[%c0_34, %c128_35], %81 {strides = array<i32>} : memref<24x512xf32, #tpu.memory_space<vmem>>, vector<24x256xf32>,
    %c0_36 = arith.constant 0 : index
    %c0_37 = arith.constant 0 : index
    %c0_38 = arith.constant 0 : index
    %87 = vector.load %arg4[%c0_36, %c0_37, %c0_38] : memref<9x24x24xf32, #tpu.memory_space<vmem>>, vector<9x24x24xf32>
    %88 = vector.extract_strided_slice %87 {offsets = [0, 0, 0], sizes = [1, 24, 24], strides = [1, 1, 1]} : vector<9x24x24xf32> to vector<1x24x24xf32>
    %89 = vector.shape_cast %88 : vector<1x24x24xf32> to vector<24x24xf32>
    %c0_39 = arith.constant 0 : index
    %c117_40 = arith.constant 117 : index
    %90 = vector.load %arg7[%c0_39, %c117_40] : memref<24x512xf32, #tpu.memory_space<vmem>>, vector<24x256xf32>
    %cst_41 = arith.constant dense<0.000000e+00> : vector<24x256xf32>
    %91 = tpu.matmul %89, %90, %cst_41 {dimension_numbers = #tpu.dot_dimension_numbers<[1], [0], [0], [1], [0, 0, 1, 1], [], []>} : vector<24x24xf32>, vector<24x256xf32>, vector<24x256xf32> -> vector<24x256xf32>
    %92 = vector.broadcast %5 : vector<24x1xf32> to vector<24x256xf32>
    %93 = arith.addf %92, %91 : vector<24x256xf32>
    %94 = vector.extract_strided_slice %87 {offsets = [1, 0, 0], sizes = [1, 24, 24], strides = [1, 1, 1]} : vector<9x24x24xf32> to vector<1x24x24xf32>
    %95 = vector.shape_cast %94 : vector<1x24x24xf32> to vector<24x24xf32>
    %c0_42 = arith.constant 0 : index
    %c118_43 = arith.constant 118 : index
    %96 = vector.load %arg7[%c0_42, %c118_43] : memref<24x512xf32, #tpu.memory_space<vmem>>, vector<24x256xf32>
    %cst_44 = arith.constant dense<0.000000e+00> : vector<24x256xf32>
    %97 = tpu.matmul %95, %96, %cst_44 {dimension_numbers = #tpu.dot_dimension_numbers<[1], [0], [0], [1], [0, 0, 1, 1], [], []>} : vector<24x24xf32>, vector<24x256xf32>, vector<24x256xf32> -> vector<24x256xf32>
    %98 = arith.addf %93, %97 : vector<24x256xf32>
    %99 = vector.extract_strided_slice %87 {offsets = [2, 0, 0], sizes = [1, 24, 24], strides = [1, 1, 1]} : vector<9x24x24xf32> to vector<1x24x24xf32>
    %100 = vector.shape_cast %99 : vector<1x24x24xf32> to vector<24x24xf32>
    %c0_45 = arith.constant 0 : index
    %c119_46 = arith.constant 119 : index
    %101 = vector.load %arg7[%c0_45, %c119_46] : memref<24x512xf32, #tpu.memory_space<vmem>>, vector<24x256xf32>
    %cst_47 = arith.constant dense<0.000000e+00> : vector<24x256xf32>
    %102 = tpu.matmul %100, %101, %cst_47 {dimension_numbers = #tpu.dot_dimension_numbers<[1], [0], [0], [1], [0, 0, 1, 1], [], []>} : vector<24x24xf32>, vector<24x256xf32>, vector<24x256xf32> -> vector<24x256xf32>
    %103 = arith.addf %98, %102 : vector<24x256xf32>
    %104 = vector.extract_strided_slice %87 {offsets = [3, 0, 0], sizes = [1, 24, 24], strides = [1, 1, 1]} : vector<9x24x24xf32> to vector<1x24x24xf32>
    %105 = vector.shape_cast %104 : vector<1x24x24xf32> to vector<24x24xf32>
    %c0_48 = arith.constant 0 : index
    %c127_49 = arith.constant 127 : index
    %106 = vector.load %arg7[%c0_48, %c127_49] : memref<24x512xf32, #tpu.memory_space<vmem>>, vector<24x256xf32>
    %cst_50 = arith.constant dense<0.000000e+00> : vector<24x256xf32>
    %107 = tpu.matmul %105, %106, %cst_50 {dimension_numbers = #tpu.dot_dimension_numbers<[1], [0], [0], [1], [0, 0, 1, 1], [], []>} : vector<24x24xf32>, vector<24x256xf32>, vector<24x256xf32> -> vector<24x256xf32>
    %108 = arith.addf %103, %107 : vector<24x256xf32>
    %109 = vector.extract_strided_slice %87 {offsets = [4, 0, 0], sizes = [1, 24, 24], strides = [1, 1, 1]} : vector<9x24x24xf32> to vector<1x24x24xf32>
    %110 = vector.shape_cast %109 : vector<1x24x24xf32> to vector<24x24xf32>
    %c0_51 = arith.constant 0 : index
    %c128_52 = arith.constant 128 : index
    %111 = vector.load %arg7[%c0_51, %c128_52] : memref<24x512xf32, #tpu.memory_space<vmem>>, vector<24x256xf32>
    %cst_53 = arith.constant dense<0.000000e+00> : vector<24x256xf32>
    %112 = tpu.matmul %110, %111, %cst_53 {dimension_numbers = #tpu.dot_dimension_numbers<[1], [0], [0], [1], [0, 0, 1, 1], [], []>} : vector<24x24xf32>, vector<24x256xf32>, vector<24x256xf32> -> vector<24x256xf32>
    %113 = arith.addf %108, %112 : vector<24x256xf32>
    %114 = vector.extract_strided_slice %87 {offsets = [5, 0, 0], sizes = [1, 24, 24], strides = [1, 1, 1]} : vector<9x24x24xf32> to vector<1x24x24xf32>
    %115 = vector.shape_cast %114 : vector<1x24x24xf32> to vector<24x24xf32>
    %c0_54 = arith.constant 0 : index
    %c129_55 = arith.constant 129 : index
    %116 = vector.load %arg7[%c0_54, %c129_55] : memref<24x512xf32, #tpu.memory_space<vmem>>, vector<24x256xf32>
    %cst_56 = arith.constant dense<0.000000e+00> : vector<24x256xf32>
    %117 = tpu.matmul %115, %116, %cst_56 {dimension_numbers = #tpu.dot_dimension_numbers<[1], [0], [0], [1], [0, 0, 1, 1], [], []>} : vector<24x24xf32>, vector<24x256xf32>, vector<24x256xf32> -> vector<24x256xf32>
    %118 = arith.addf %113, %117 : vector<24x256xf32>
    %119 = vector.extract_strided_slice %87 {offsets = [6, 0, 0], sizes = [1, 24, 24], strides = [1, 1, 1]} : vector<9x24x24xf32> to vector<1x24x24xf32>
    %120 = vector.shape_cast %119 : vector<1x24x24xf32> to vector<24x24xf32>
    %c0_57 = arith.constant 0 : index
    %c137_58 = arith.constant 137 : index
    %121 = vector.load %arg7[%c0_57, %c137_58] : memref<24x512xf32, #tpu.memory_space<vmem>>, vector<24x256xf32>
    %cst_59 = arith.constant dense<0.000000e+00> : vector<24x256xf32>
    %122 = tpu.matmul %120, %121, %cst_59 {dimension_numbers = #tpu.dot_dimension_numbers<[1], [0], [0], [1], [0, 0, 1, 1], [], []>} : vector<24x24xf32>, vector<24x256xf32>, vector<24x256xf32> -> vector<24x256xf32>
    %123 = arith.addf %118, %122 : vector<24x256xf32>
    %124 = vector.extract_strided_slice %87 {offsets = [7, 0, 0], sizes = [1, 24, 24], strides = [1, 1, 1]} : vector<9x24x24xf32> to vector<1x24x24xf32>
    %125 = vector.shape_cast %124 : vector<1x24x24xf32> to vector<24x24xf32>
    %c0_60 = arith.constant 0 : index
    %c138_61 = arith.constant 138 : index
    %126 = vector.load %arg7[%c0_60, %c138_61] : memref<24x512xf32, #tpu.memory_space<vmem>>, vector<24x256xf32>
    %cst_62 = arith.constant dense<0.000000e+00> : vector<24x256xf32>
    %127 = tpu.matmul %125, %126, %cst_62 {dimension_numbers = #tpu.dot_dimension_numbers<[1], [0], [0], [1], [0, 0, 1, 1], [], []>} : vector<24x24xf32>, vector<24x256xf32>, vector<24x256xf32> -> vector<24x256xf32>
    %128 = arith.addf %123, %127 : vector<24x256xf32>
    %129 = vector.extract_strided_slice %87 {offsets = [8, 0, 0], sizes = [1, 24, 24], strides = [1, 1, 1]} : vector<9x24x24xf32> to vector<1x24x24xf32>
    %130 = vector.shape_cast %129 : vector<1x24x24xf32> to vector<24x24xf32>
    %c0_63 = arith.constant 0 : index
    %c139_64 = arith.constant 139 : index
    %131 = vector.load %arg7[%c0_63, %c139_64] : memref<24x512xf32, #tpu.memory_space<vmem>>, vector<24x256xf32>
    %cst_65 = arith.constant dense<0.000000e+00> : vector<24x256xf32>
    %132 = tpu.matmul %130, %131, %cst_65 {dimension_numbers = #tpu.dot_dimension_numbers<[1], [0], [0], [1], [0, 0, 1, 1], [], []>} : vector<24x24xf32>, vector<24x256xf32>, vector<24x256xf32> -> vector<24x256xf32>
    %133 = arith.addf %128, %132 : vector<24x256xf32>
    %134 = vector.broadcast %0 : vector<1x256xf32> to vector<24x256xf32>
    %135 = arith.mulf %133, %134 : vector<24x256xf32>
    %cst_66 = arith.constant dense<0.000000e+00> : vector<24xf32>
    %136 = vector.multi_reduction <add>, %135, %cst_66 [1] : vector<24x256xf32> to vector<24xf32>
    %137 = vector.shape_cast %136 : vector<24xf32> to vector<24x1xf32>
    %138 = arith.mulf %135, %133 : vector<24x256xf32>
    %cst_67 = arith.constant dense<0.000000e+00> : vector<24xf32>
    %139 = vector.multi_reduction <add>, %138, %cst_67 [1] : vector<24x256xf32> to vector<24xf32>
    %140 = vector.shape_cast %139 : vector<24xf32> to vector<24x1xf32>
    %cst_68 = arith.constant 7.812500e-03 : f32
    %141 = vector.broadcast %cst_68 : f32 to vector<24x1xf32>
    %142 = arith.mulf %137, %141 : vector<24x1xf32>
    %cst_69 = arith.constant 7.812500e-03 : f32
    %143 = vector.broadcast %cst_69 : f32 to vector<24x1xf32>
    %144 = arith.mulf %140, %143 : vector<24x1xf32>
    %145 = arith.mulf %142, %142 : vector<24x1xf32>
    %146 = arith.subf %144, %145 : vector<24x1xf32>
    %cst_70 = arith.constant 9.99999974E-6 : f32
    %147 = vector.broadcast %cst_70 : f32 to vector<24x1xf32>
    %148 = arith.addf %146, %147 : vector<24x1xf32>
    %149 = math.rsqrt %148 : vector<24x1xf32>
    %150 = arith.mulf %6, %149 : vector<24x1xf32>
    %151 = arith.mulf %142, %150 : vector<24x1xf32>
    %152 = arith.subf %7, %151 : vector<24x1xf32>
    %153 = vector.broadcast %150 : vector<24x1xf32> to vector<24x256xf32>
    %154 = arith.mulf %133, %153 : vector<24x256xf32>
    %155 = vector.broadcast %152 : vector<24x1xf32> to vector<24x256xf32>
    %156 = arith.addf %154, %155 : vector<24x256xf32>
    %c0_71 = arith.constant 0 : index
    %c128_72 = arith.constant 128 : index
    %157 = vector.load %arg1[%c0_71, %c128_72] : memref<24x512xf32, #tpu.memory_space<vmem>>, vector<24x256xf32>
    %158 = arith.addf %156, %157 : vector<24x256xf32>
    %cst_73 = arith.constant 0.000000e+00 : f32
    %159 = vector.broadcast %cst_73 : f32 to vector<24x256xf32>
    %160 = arith.maximumf %158, %159 : vector<24x256xf32>
    %c0_74 = arith.constant 0 : index
    %c0_75 = arith.constant 0 : index
    %161 = vector.load %arg6[%c0_74, %c0_75] : memref<24x256xf32, #tpu.memory_space<vmem>>, vector<24x256xf32>
    tpu.vector_store %arg6[%c0_74, %c0_75], %160 {strides = array<i32>} : memref<24x256xf32, #tpu.memory_space<vmem>>, vector<24x256xf32>,
    return
  }
  func.func @transform_0(%arg0: i32) -> (i32, i32) {
    %c0_i32 = arith.constant 0 : i32
    %c0_i32_0 = arith.constant 0 : i32
    %c0_i32_1 = arith.constant 0 : i32
    return %c0_i32, %c0_i32_0 : i32, i32
  }
  func.func @transform_1(%arg0: i32) -> (i32, i32) {
    %c0_i32 = arith.constant 0 : i32
    %c0_i32_0 = arith.constant 0 : i32
    %c0_i32_1 = arith.constant 0 : i32
    return %c0_i32, %c0_i32_0 : i32, i32
  }
  func.func @transform_2(%arg0: i32) -> (i32, i32, i32) {
    %c0_i32 = arith.constant 0 : i32
    %c0_i32_0 = arith.constant 0 : i32
    %c0_i32_1 = arith.constant 0 : i32
    %c0_i32_2 = arith.constant 0 : i32
    return %c0_i32, %c0_i32_0, %c0_i32_1 : i32, i32, i32
  }
  func.func @transform_3(%arg0: i32) -> (i32, i32, i32) {
    %c0_i32 = arith.constant 0 : i32
    %c0_i32_0 = arith.constant 0 : i32
    %c0_i32_1 = arith.constant 0 : i32
    %c0_i32_2 = arith.constant 0 : i32
    return %c0_i32, %c0_i32_0, %c0_i32_1 : i32, i32, i32
  }
  func.func @transform_4(%arg0: i32) -> (i32, i32) {
    %c0_i32 = arith.constant 0 : i32
    %c0_i32_0 = arith.constant 0 : i32
    %c0_i32_1 = arith.constant 0 : i32
    return %c0_i32, %c0_i32_0 : i32, i32
  }
  func.func @transform_5(%arg0: i32) -> (i32, i32) {
    %c0_i32 = arith.constant 0 : i32
    %c0_i32_0 = arith.constant 0 : i32
    %c0_i32_1 = arith.constant 0 : i32
    return %c0_i32, %c0_i32_0 : i32, i32
  }
}

</mosaic_0001>

<bundles_post_ra>
// kernel: res_block_forward.1
= control target key start
LH: loop header
LB: loop body
LE: loop exit
PB: predicated region body
PF: predicated region fallthrough
CT: control target
= control target key end

     0   :  { %s2851_s22 = smov 11   ;;  %s2852_s12 = smov 10   ;;  %v2853_v9 = vmov 0.0   ;;  %vm87_vm0 = vcmask 89088   ;;  %vm100_vm1 = vcmask 195584   ;;  %vm232_vm2 = vcmask 80896   ;;  %s3890_s0 = inlined_call_operand.vmem [shape: f32[24,512], index: 0, kind: input, shape index: {}]   ;;  %s3891_s2 = inlined_call_operand.vmem [shape: f32[9,24,24], index: 2, kind: input, shape index: {}]   ;;  %s3892_s4 = inlined_call_operand.vmem [shape: f32[24,8], index: 4, kind: input, shape index: {}]   ;;  %s3893_s1 = inlined_call_operand.vmem [shape: f32[1,256], index: 1, kind: input, shape index: {}]   ;;  %s3894_s3 = inlined_call_operand.vmem [shape: f32[9,24,24], index: 3, kind: input, shape index: {}]   ;;  %s3895_s5 = inlined_call_operand.vmem [shape: f32[24,256], index: 5, kind: output, shape index: {}]  }
   0x1   :  { %v2899_v0 = vld [vmem:[%s3890_s0 + $0x48] sm:$0xff]  ;;  %v57_v1 = vld [vmem:[%s3890_s0 + $0x40] sm:$0xff]  ;;  %v2910_v2 = vld [vmem:[%s3890_s0 + $0x50] sm:$0xff]  ;;  %174 = vmatprep.mubr.f32.mxu0 %v2853_v9  ;;  %318 = vmatprep.mubr.f32.mxu1 %v2853_v9  ;;  %s2854_s13 = smov 9   ;;  %s2855_s14 = smov 1   ;;  %vm361_vm3 = vcmask 72704  }
   0x2   :  { %83 = vrot.lane.b32.xlu0 %v2899_v0, %s2851_s22  ;;  %81 = vrot.lane.b32.xlu1 %v57_v1, %s2851_s22  ;;  %v2915_v3 = vld [vmem:[%s3890_s0 + $0x28] sm:$0xff]  ;;  %v2924_v4 = vld [vmem:[%s3890_s0 + $0x30] sm:$0xff]  ;;  %s2856_s17 = smov 127   ;;  %s2857_s20 = smov 119   ;;  %v2860_v39 = vmov 0   ;;  %vm490_vm4 = vcmask 7168  }
   0x3   :  { %v54_v5 = vld [vmem:[%s3890_s0 + $0x20] sm:$0xff]  ;;  %v2935_v6 = vld [vmem:[%s3890_s0 + $0x10] sm:$0xff]  ;;  %v2940_v7 = vld [vmem:[%s3890_s0 + $0x8] sm:$0xff]  ;;  %s2858_s24 = smov 118   ;;  %s2859_s25 = smov 117   ;;  %2785 = vset.pattern.permute.xlu1 %v2860_v39  ;;  %2784 = vset.pattern.permute.xlu0 %v2860_v39  ;;  %vm735_vm5 = vcmask 1039360  }
   0x4   :  { %v51_v8 = vld [vmem:[%s3890_s0] sm:$0xff]  ;;  %v707_v10 = vld [vmem:[%s3890_s0 + $0x58] sm:$0xff]  ;;  %v25_v34 = vld [vmem:[%s3891_s2 + $0x8] sm:$0xff]  ;;  %vm864_vm6 = vcmask 973824   ;;  %vm993_vm7 = vcmask 965632   ;;  %vm1122_vm8 = vcmask 957440  }
   0x5   :  { %v704_v11 = vld [vmem:[%s3890_s0 + $0x38] sm:$0xff]  ;;  %v24_v28 = vld [vmem:[%s3891_s2] sm:$0xff]  ;;  %v26_v38 = vld [vmem:[%s3891_s2 + $0x10] sm:$0xff] }
   0x6   :  { %85 = vrot.lane.b32.xlu0 %v2910_v2, %s2851_s22  ;;  %77 = vrot.lane.b32.xlu1 %v2915_v3, %s2851_s22  ;;  %v3023_v12 = vld [vmem:[%s3890_s0 + $0x18] sm:$0xff]  ;;  %v3097_v40 = vld [vmem:[%s3892_s4 + $0x8] sm:$0xff] }
   0x7   :  { %v3103_v43 = vld [vmem:[%s3892_s4 + $0x10] sm:$0xff]  ;;  %v3112_v47 = vld [vmem:[%s3892_s4] sm:$0xff]  ;;  %v27_v58 = vld [vmem:[%s3891_s2 + $0x18] sm:$0xff] }
   0x8   :  { %v28_v63 = vld [vmem:[%s3891_s2 + $0x20] sm:$0xff] }
   0xa   :  { %79 = vrot.lane.b32.xlu0 %v2924_v4, %s2851_s22  ;;  %75 = vrot.lane.b32.xlu1 %v54_v5, %s2851_s22 }
   0xe   :  { %73 = vrot.lane.b32.xlu1 %v2935_v6, %s2851_s22  ;;  %71 = vrot.lane.b32.xlu0 %v2940_v7, %s2851_s22 }
  0x12   :  { %228 = vrot.lane.b32.xlu1 %v2899_v0, %s2852_s12  ;;  %69 = vrot.lane.b32.xlu0 %v51_v8, %s2851_s22 }
  0x16   :  { %226 = vrot.lane.b32.xlu1 %v57_v1, %s2852_s12  ;;  %230 = vrot.lane.b32.xlu0 %v2910_v2, %s2852_s12 }
  0x1a   :  { %224 = vrot.lane.b32.xlu1 %v2924_v4, %s2852_s12  ;;  %222 = vrot.lane.b32.xlu0 %v2915_v3, %s2852_s12 }
  0x1e   :  { %359 = vrot.lane.b32.xlu1 %v2910_v2, %s2854_s13  ;;  %357 = vrot.lane.b32.xlu0 %v2899_v0, %s2854_s13 }
  0x22   :  { %355 = vrot.lane.b32.xlu1 %v57_v1, %s2854_s13  ;;  %220 = vrot.lane.b32.xlu0 %v54_v5, %s2852_s12 }
  0x26   :  { %218 = vrot.lane.b32.xlu1 %v2935_v6, %s2852_s12  ;;  %216 = vrot.lane.b32.xlu0 %v2940_v7, %s2852_s12 }
  0x2a   :  { %353 = vrot.lane.b32.xlu1 %v2924_v4, %s2854_s13  ;;  %351 = vrot.lane.b32.xlu0 %v2915_v3, %s2854_s13 }
  0x2e   :  { %349 = vrot.lane.b32.xlu1 %v54_v5, %s2854_s13  ;;  %214 = vrot.lane.b32.xlu0 %v51_v8, %s2852_s12 }
  0x32   :  { %347 = vrot.lane.b32.xlu1 %v2935_v6, %s2854_s13  ;;  %345 = vrot.lane.b32.xlu0 %v2940_v7, %s2854_s13 }
  0x36   :  { %486 = vrot.lane.b32.xlu1 %v2899_v0, %s2855_s14  ;;  %343 = vrot.lane.b32.xlu0 %v51_v8, %s2854_s13 }
  0x3a   :  { %484 = vrot.lane.b32.xlu1 %v57_v1, %s2855_s14  ;;  %488 = vrot.lane.b32.xlu0 %v2910_v2, %s2855_s14 }
  0x3e   :  { %482 = vrot.lane.b32.xlu1 %v2924_v4, %s2855_s14  ;;  %480 = vrot.lane.b32.xlu0 %v2915_v3, %s2855_s14 }
  0x42   :  { %474 = vrot.lane.b32.xlu1 %v2940_v7, %s2855_s14  ;;  %478 = vrot.lane.b32.xlu0 %v54_v5, %s2855_s14 }
  0x46   :  { %472 = vrot.lane.b32.xlu1 %v51_v8, %s2855_s14  ;;  %476 = vrot.lane.b32.xlu0 %v2935_v6, %s2855_s14 }
  0x4a   :  { %733 = vrot.lane.b32.xlu1 %v707_v10, %s2856_s17  ;;  %731 = vrot.lane.b32.xlu0 %v2910_v2, %s2856_s17 }
  0x4e   :  { %725 = vrot.lane.b32.xlu1 %v2924_v4, %s2856_s17  ;;  %729 = vrot.lane.b32.xlu0 %v2899_v0, %s2856_s17 }
  0x52   :  { %860 = vrot.lane.b32.xlu1 %v2910_v2, %s2857_s20  ;;  %727 = vrot.lane.b32.xlu0 %v704_v11, %s2856_s17 }
  0x56   :  { %723 = vrot.lane.b32.xlu1 %v2915_v3, %s2856_s17  ;;  %862 = vrot.lane.b32.xlu0 %v707_v10, %s2857_s20 }
  0x5a   :  { %719 = vrot.lane.b32.xlu1 %v2935_v6, %s2856_s17  ;;  %858 = vrot.lane.b32.xlu0 %v2899_v0, %s2857_s20 }
  0x5e   :  { %854 = vrot.lane.b32.xlu1 %v2924_v4, %s2857_s20  ;;  %721 = vrot.lane.b32.xlu0 %v3023_v12, %s2856_s17 }
  0x62   :  { %717 = vrot.lane.b32.xlu1 %v2940_v7, %s2856_s17  ;;  %856 = vrot.lane.b32.xlu0 %v704_v11, %s2857_s20 }
  0x66   :  { %848 = vrot.lane.b32.xlu1 %v2935_v6, %s2857_s20  ;;  %852 = vrot.lane.b32.xlu0 %v2915_v3, %s2857_s20 }
  0x6a   :  { %846 = vrot.lane.b32.xlu1 %v2940_v7, %s2857_s20  ;;  %850 = vrot.lane.b32.xlu0 %v3023_v12, %s2857_s20 }
  0x6e   :  { %991 = vrot.lane.b32.xlu1 %v707_v10, %s2858_s24  ;;  %989 = vrot.lane.b32.xlu0 %v2910_v2, %s2858_s24 }
  0x72   :  { %983 = vrot.lane.b32.xlu1 %v2924_v4, %s2858_s24  ;;  %987 = vrot.lane.b32.xlu0 %v2899_v0, %s2858_s24 }
  0x74   :  { %v84_v13 = vpop.permute.xlu0 %83  ;;  %v82_v14 = vpop.permute.xlu1 %81 }
  0x75   :  { %v92_v18 = vsel %vm87_vm0, %v82_v14, %v84_v13 }
  0x76   :  { %1118 = vrot.lane.b32.xlu1 %v2910_v2, %s2859_s25  ;;  %985 = vrot.lane.b32.xlu0 %v704_v11, %s2858_s24 }
  0x78   :  { %v86_v15 = vpop.permute.xlu0 %85  ;;  %v78_v16 = vpop.permute.xlu1 %77 }
  0x79   :  { %v93_v17 = vsel %vm87_vm0, %v84_v13, %v86_v15  ;;  %v31_v15 = vld [vmem:[%s3891_s2 + $0x38] sm:$0xff] }
  0x7a   :  { %136 = vmatprep.subr.mxu0 %v93_v17  ;;  %981 = vrot.lane.b32.xlu1 %v2915_v3, %s2858_s24 }
  0x7b   :  { %1120 = vrot.lane.b32.xlu0 %v707_v10, %s2859_s25  ;;  %137 = vmatpush1.msra.mxu0 %v92_v18  ;;  %v29_v10 = vld [vmem:[%s3891_s2 + $0x28] sm:$0xff] }
  0x7c   :  { %v80_v19 = vpop.permute.xlu0 %79  ;;  %v76_v20 = vpop.permute.xlu1 %75 }
  0x7d   :  { %v91_v21 = vsel %vm87_vm0, %v78_v16, %v80_v19  ;;  %v90_v22 = vsel %vm87_vm0, %v76_v20, %v78_v16  ;;  %v32_v19 = vld [vmem:[%s3891_s2 + $0x40] sm:$0xff] }
  0x7e   :  { %138 = vmatprep.subr.mxu0 %v91_v21  ;;  %977 = vrot.lane.b32.xlu1 %v2935_v6, %s2858_s24 }
  0x7f   :  { %1116 = vrot.lane.b32.xlu0 %v2899_v0, %s2859_s25  ;;  %139 = vmatpush1.msra.mxu0 %v90_v22 }
  0x80   :  { %v74_v23 = vpop.permute.xlu1 %73  ;;  %v72_v24 = vpop.permute.xlu0 %71 }
  0x81   :  { %v89_v25 = vsel %vm87_vm0, %v72_v24, %v74_v23 }
  0x82   :  { %140 = vmatprep.subr.mxu0 %v89_v25  ;;  %1112 = vrot.lane.b32.xlu1 %v2924_v4, %s2859_s25  ;;  %v33_v25 = vld [vmem:[%s3891_s2 + $0x48] sm:$0xff] }
  0x83   :  { %979 = vrot.lane.b32.xlu0 %v3023_v12, %s2858_s24 }
  0x84   :  { %v229_v26 = vpop.permute.xlu1 %228  ;;  %v70_v27 = vpop.permute.xlu0 %69 }
  0x85   :  { %v88_v29 = vsel %vm87_vm0, %v70_v27, %v72_v24 }
  0x86   :  { %975 = vrot.lane.b32.xlu1 %v2940_v7, %s2858_s24  ;;  %141 = vmatpush1.msra.mxu0 %v88_v29 }
  0x87   :  { %1114 = vrot.lane.b32.xlu0 %v704_v11, %s2859_s25  ;;  %2715 = vmatmul.mubr.msk.f32.vlgmr.msra.gmra.mxu0 %vm100_vm1, %v24_v28  ;;  %v30_v11 = vld [vmem:[%s3891_s2 + $0x30] sm:$0xff] }
  0x88   :  { %v227_v30 = vpop.permute.xlu1 %226  ;;  %v231_v31 = vpop.permute.xlu0 %230  ;;  %180 = vmatprep.mubr.f32.mxu0 %v2853_v9  ;;  %v38_v28 = vld [vmem:[%s3891_s2 + $0x70] sm:$0xff] }
  0x89   :  { %v238_v32 = vsel %vm232_vm2, %v229_v26, %v231_v31  ;;  %v237_v33 = vsel %vm232_vm2, %v227_v30, %v229_v26  ;;  %v34_v30 = vld [vmem:[%s3891_s2 + $0x50] sm:$0xff] }
  0x8a   :  { %1106 = vrot.lane.b32.xlu1 %v2935_v6, %s2859_s25  ;;  %280 = vmatprep.subr.mxu1 %v238_v32 }
  0x8b   :  { %1110 = vrot.lane.b32.xlu0 %v2915_v3, %s2859_s25  ;;  %281 = vmatpush1.msra.mxu1 %v237_v33 }
  0x8c   :  { %v225_v35 = vpop.permute.xlu1 %224  ;;  %v223_v36 = vpop.permute.xlu0 %222  ;;  %2716 = vmatmul.mubr.msk.f32.gmra.mxu0 %vm100_vm1, %v25_v34  ;;  %v35_v34 = vld [vmem:[%s3891_s2 + $0x58] sm:$0xff] }
  0x8d   :  { %v236_v37 = vsel %vm232_vm2, %v223_v36, %v225_v35  ;;  %186 = vmatprep.mubr.f32.mxu0 %v2853_v9 }
  0x8e   :  { %1104 = vrot.lane.b32.xlu1 %v2940_v7, %s2859_s25  ;;  %282 = vmatprep.subr.mxu1 %v236_v37 }
  0x8f   :  { %1108 = vrot.lane.b32.xlu0 %v3023_v12, %s2859_s25 }
  0x90   :  { %v360_v41 = vpop.permute.xlu1 %359  ;;  %v358_v42 = vpop.permute.xlu0 %357  ;;  %2717 = vmatmul.mubr.msk.f32.gmra.mxu0 %vm100_vm1, %v26_v38 }
  0x91   :  { %v367_v44 = vsel %vm361_vm3, %v358_v42, %v360_v41  ;;  %447 = vmatprep.mubr.f32.mxu0 %v2853_v9 }
  0x92   :  { %409 = vmatprep.subr.mxu0 %v367_v44  ;;  %200 = vperm.xlu1 %2785, %v3097_v40  }
  0x93   :  { %205 = vperm.xlu0 %2784, %v3103_v43  }
  0x94   :  { %v356_v45 = vpop.permute.xlu1 %355  ;;  %v221_v46 = vpop.permute.xlu0 %220 }
  0x95   :  { %v366_v48 = vsel %vm361_vm3, %v356_v45, %v358_v42  ;;  %v235_v49 = vsel %vm232_vm2, %v221_v46, %v223_v36 }
  0x96   :  { %283 = vmatpush1.msra.mxu1 %v235_v49  ;;  %410 = vmatpush1.msra.mxu0 %v366_v48 }
  0x97   :  { %195 = vperm.xlu1 %2785, %v3112_v47  }
  0x98   :  { %v219_v50 = vpop.permute.xlu1 %218  ;;  %v217_v51 = vpop.permute.xlu0 %216 }
  0x99   :  { %v234_v52 = vsel %vm232_vm2, %v217_v51, %v219_v50 }
  0x9a   :  { %284 = vmatprep.subr.mxu1 %v234_v52 }
  0x9c   :  { %v354_v53 = vpop.permute.xlu1 %353  ;;  %v352_v54 = vpop.permute.xlu0 %351 }
  0x9d   :  { %v365_v55 = vsel %vm361_vm3, %v352_v54, %v354_v53  ;;  %v39_v53 = vld [vmem:[%s3891_s2 + $0x78] sm:$0xff] }
  0x9e   :  { %411 = vmatprep.subr.mxu0 %v365_v55 }
  0xa0   :  { %v350_v56 = vpop.permute.xlu1 %349  ;;  %v215_v57 = vpop.permute.xlu0 %214 }
  0xa1   :  { %v364_v59 = vsel %vm361_vm3, %v350_v56, %v352_v54  ;;  %v233_v60 = vsel %vm232_vm2, %v215_v57, %v217_v51 }
  0xa2   :  { %285 = vmatpush1.msra.mxu1 %v233_v60  ;;  %412 = vmatpush1.msra.mxu0 %v364_v59 }
  0xa3   :  { %2718 = vmatmul.mubr.msk.f32.vlgmr.msra.gmra.mxu1 %vm100_vm1, %v27_v58  ;;  %v40_v58 = vld [vmem:[%s3891_s2 + $0x80] sm:$0xff] }
  0xa4   :  { %v348_v61 = vpop.permute.xlu1 %347  ;;  %v346_v62 = vpop.permute.xlu0 %345  ;;  %324 = vmatprep.mubr.f32.mxu1 %v2853_v9 }
  0xa5   :  { %v363_v1 = vsel %vm361_vm3, %v346_v62, %v348_v61 }
  0xa6   :  { %413 = vmatprep.subr.mxu0 %v363_v1 }
  0xa7   :  { %2719 = vmatmul.mubr.msk.f32.gmra.mxu1 %vm100_vm1, %v28_v63 }
  0xa8   :  { %v487_v5 = vpop.permute.xlu1 %486  ;;  %v344_v8 = vpop.permute.xlu0 %343  ;;  %330 = vmatprep.mubr.f32.mxu1 %v2853_v9 }
  0xa9   :  { %v362_v12 = vsel %vm361_vm3, %v344_v8, %v346_v62  ;;  %v41_v62 = vld [vmem:[%s3891_s2 + $0x88] sm:$0xff] }
  0xaa   :  { %414 = vmatpush1.msra.mxu0 %v362_v12  ;;  %v43_v12 = vld [vmem:[%s3891_s2 + $0x98] sm:$0xff] }
  0xab   :  { %2720 = vmatmul.mubr.msk.f32.gmra.mxu1 %vm100_vm1, %v29_v10  ;;  %2721 = vmatmul.mubr.msk.f32.vlgmr.msra.gmra.mxu0 %vm100_vm1, %v30_v11 }
  0xac   :  { %v485_v13 = vpop.permute.xlu1 %484  ;;  %v489_v14 = vpop.permute.xlu0 %488  ;;  %576 = vmatprep.mubr.f32.mxu1 %v2853_v9  ;;  %636 = vmatprep.subr.mxu0 %v2910_v2 }
  0xad   :  { %v495_v16 = vsel %vm490_vm4, %v485_v13, %v487_v5  ;;  %v496_v17 = vsel %vm490_vm4, %v487_v5, %v489_v14  ;;  %453 = vmatprep.mubr.f32.mxu0 %v2853_v9  ;;  %637 = vmatpush1.msra.mxu0 %v2899_v0  ;;  %v42_v5 = vld [vmem:[%s3891_s2 + $0x90] sm:$0xff] }
  0xae   :  { %538 = vmatprep.subr.mxu1 %v496_v17  ;;  %638 = vmatprep.subr.mxu0 %v2924_v4 }
  0xaf   :  { %539 = vmatpush1.msra.mxu1 %v495_v16  ;;  %2722 = vmatmul.mubr.msk.f32.gmra.mxu0 %vm100_vm1, %v31_v15  ;;  %v44_v16 = vld [vmem:[%s3891_s2 + $0xa0] sm:$0xff] }
  0xb0   :  { %v483_v18 = vpop.permute.xlu1 %482  ;;  %v481_v2 = vpop.permute.xlu0 %480  ;;  %639 = vmatpush1.msra.mxu0 %v2915_v3  ;;  %459 = vmatprep.mubr.f32.mxu0 %v2853_v9  ;;  %v36_v3 = vld [vmem:[%s3891_s2 + $0x60] sm:$0xff] }
  0xb1   :  { %v494_v20 = vsel %vm490_vm4, %v481_v2, %v483_v18  ;;  %640 = vmatprep.subr.mxu0 %v2935_v6 }
  0xb2   :  { %540 = vmatprep.subr.mxu1 %v494_v20  ;;  %641 = vmatpush1.msra.mxu0 %v2940_v7  ;;  %v37_v7 = vld [vmem:[%s3891_s2 + $0x68] sm:$0xff] }
  0xb3   :  { %2723 = vmatmul.mubr.msk.f32.gmra.mxu0 %vm100_vm1, %v32_v19 }
  0xb4   :  { %v475_v0 = vpop.permute.xlu1 %474  ;;  %v479_v4 = vpop.permute.xlu0 %478  ;;  %674 = vmatprep.mubr.f32.mxu0 %v2853_v9 }
  0xb5   :  { %v493_v21 = vsel %vm490_vm4, %v479_v4, %v481_v2 }
  0xb6   :  { %541 = vmatpush1.msra.mxu1 %v493_v21 }
  0xb7   :  { %2727 = vmatmul.mubr.msk.f32.vlgmr.msra.gmra.mxu0 %vm100_vm1, %v36_v3 }
  0xb8   :  { %v473_v22 = vpop.permute.xlu1 %472  ;;  %v477_v6 = vpop.permute.xlu0 %476  ;;  %680 = vmatprep.mubr.f32.mxu0 %v2853_v9 }
  0xb9   :  { %v491_v23 = vsel %vm490_vm4, %v473_v22, %v475_v0  ;;  %v492_v24 = vsel %vm490_vm4, %v475_v0, %v477_v6 }
  0xba   :  { %542 = vmatprep.subr.mxu1 %v492_v24 }
  0xbb   :  { %543 = vmatpush1.msra.mxu1 %v491_v23  ;;  %2728 = vmatmul.mubr.msk.f32.gmra.mxu0 %vm100_vm1, %v37_v7 }
  0xbc   :  { %v734_v26 = vpop.permute.xlu1 %733  ;;  %v732_v27 = vpop.permute.xlu0 %731  ;;  %2724 = vmatmul.mubr.msk.f32.vlgmr.msra.gmra.mxu1 %vm100_vm1, %v33_v25  ;;  %686 = vmatprep.mubr.f32.mxu0 %v2853_v9  ;;  %v45_v25 = vld [vmem:[%s3891_s2 + $0xa8] sm:$0xff] }
  0xbd   :  { %v741_v29 = vsel %vm735_vm5, %v732_v27, %v734_v26  ;;  %582 = vmatprep.mubr.f32.mxu1 %v2853_v9 }
  0xbe   :  { %783 = vmatprep.subr.mxu1 %v741_v29 }
  0xbf   :  { %2729 = vmatmul.mubr.msk.f32.gmra.mxu0 %vm100_vm1, %v38_v28 }
  0xc0   :  { %v726_v31 = vpop.permute.xlu1 %725  ;;  %v730_v32 = vpop.permute.xlu0 %729  ;;  %2725 = vmatmul.mubr.msk.f32.gmra.mxu1 %vm100_vm1, %v34_v30  ;;  %950 = vmatprep.mubr.f32.mxu0 %v2853_v9  ;;  %v46_v30 = vld [vmem:[%s3891_s2 + $0xb0] sm:$0xff] }
  0xc1   :  { %v740_v33 = vsel %vm735_vm5, %v730_v32, %v732_v27  ;;  %588 = vmatprep.mubr.f32.mxu1 %v2853_v9 }
  0xc2   :  { %784 = vmatpush1.msra.mxu1 %v740_v33 }
  0xc4   :  { %v861_v35 = vpop.permute.xlu1 %860  ;;  %v728_v36 = vpop.permute.xlu0 %727  ;;  %2726 = vmatmul.mubr.msk.f32.gmra.mxu1 %vm100_vm1, %v35_v34  ;;  %v47_v34 = vld [vmem:[%s3891_s2 + $0xb8] sm:$0xff] }
  0xc5   :  { %v739_v37 = vsel %vm735_vm5, %v726_v31, %v728_v36  ;;  %821 = vmatprep.mubr.f32.mxu1 %v2853_v9 }
  0xc6   :  { %785 = vmatprep.subr.mxu1 %v739_v37 }
  0xc8   :  { %v724_v38 = vpop.permute.xlu1 %723  ;;  %v863_v39 = vpop.permute.xlu0 %862 }
  0xc9   :  { %v738_v41 = vsel %vm735_vm5, %v724_v38, %v726_v31  ;;  %v870_v42 = vsel %vm864_vm6, %v861_v35, %v863_v39  ;;  %v48_v38 = vld [vmem:[%s3891_s2 + $0xc0] sm:$0xff]  ;;  %v49_v39 = vld [vmem:[%s3891_s2 + $0xc8] sm:$0xff] }
  0xca   :  { %786 = vmatpush1.msra.mxu1 %v738_v41  ;;  %912 = vmatprep.subr.mxu0 %v870_v42  ;;  %v50_v41 = vld [vmem:[%s3891_s2 + $0xd0] sm:$0xff] }
  0xcc   :  { %v720_v44 = vpop.permute.xlu1 %719  ;;  %v859_v45 = vpop.permute.xlu0 %858 }
  0xcd   :  { %v869_v46 = vsel %vm864_vm6, %v859_v45, %v861_v35 }
  0xce   :  { %913 = vmatpush1.msra.mxu0 %v869_v46 }
  0xd0   :  { %v855_v48 = vpop.permute.xlu1 %854  ;;  %v722_v49 = vpop.permute.xlu0 %721 }
  0xd1   :  { %v737_v50 = vsel %vm735_vm5, %v720_v44, %v722_v49 }
  0xd2   :  { %787 = vmatprep.subr.mxu1 %v737_v50 }
  0xd4   :  { %v718_v51 = vpop.permute.xlu1 %717  ;;  %v857_v52 = vpop.permute.xlu0 %856 }
  0xd5   :  { %v736_v54 = vsel %vm735_vm5, %v718_v51, %v720_v44  ;;  %v868_v55 = vsel %vm864_vm6, %v855_v48, %v857_v52 }
  0xd6   :  { %788 = vmatpush1.msra.mxu1 %v736_v54  ;;  %914 = vmatprep.subr.mxu0 %v868_v55 }
  0xd7   :  { %2730 = vmatmul.mubr.msk.f32.vlgmr.msra.gmra.mxu1 %vm100_vm1, %v39_v53 }
  0xd8   :  { %v849_v56 = vpop.permute.xlu1 %848  ;;  %v853_v57 = vpop.permute.xlu0 %852  ;;  %827 = vmatprep.mubr.f32.mxu1 %v2853_v9 }
  0xd9   :  { %v867_v59 = vsel %vm864_vm6, %v853_v57, %v855_v48 }
  0xda   :  { %915 = vmatpush1.msra.mxu0 %v867_v59 }
  0xdb   :  { %2731 = vmatmul.mubr.msk.f32.gmra.mxu1 %vm100_vm1, %v40_v58 }
  0xdc   :  { %v847_v60 = vpop.permute.xlu1 %846  ;;  %v851_v61 = vpop.permute.xlu0 %850  ;;  %833 = vmatprep.mubr.f32.mxu1 %v2853_v9 }
  0xdd   :  { %v865_v63 = vsel %vm864_vm6, %v847_v60, %v849_v56  ;;  %v866_v1 = vsel %vm864_vm6, %v849_v56, %v851_v61 }
  0xde   :  { %916 = vmatprep.subr.mxu0 %v866_v1 }
  0xdf   :  { %917 = vmatpush1.msra.mxu0 %v865_v63  ;;  %2732 = vmatmul.mubr.msk.f32.gmra.mxu1 %vm100_vm1, %v41_v62 }
  0xe0   :  { %v992_v8 = vpop.permute.xlu1 %991  ;;  %2733 = vmatmul.mubr.msk.f32.vlgmr.msra.gmra.mxu0 %vm100_vm1, %v42_v5  ;;  %v990_v10 = vpop.permute.xlu0 %989  ;;  %1079 = vmatprep.mubr.f32.mxu1 %v2853_v9 }
  0xe1   :  { %v999_v11 = vsel %vm993_vm7, %v990_v10, %v992_v8  ;;  %956 = vmatprep.mubr.f32.mxu0 %v2853_v9 }
  0xe2   :  { %1041 = vmatprep.subr.mxu1 %v999_v11 }
  0xe4   :  { %v984_v13 = vpop.permute.xlu1 %983  ;;  %2734 = vmatmul.mubr.msk.f32.gmra.mxu0 %vm100_vm1, %v43_v12  ;;  %v988_v14 = vpop.permute.xlu0 %987 }
  0xe5   :  { %v998_v15 = vsel %vm993_vm7, %v988_v14, %v990_v10  ;;  %962 = vmatprep.mubr.f32.mxu0 %v2853_v9 }
  0xe6   :  { %1042 = vmatpush1.msra.mxu1 %v998_v15 }
  0xe8   :  { %v1119_v17 = vpop.permute.xlu1 %1118  ;;  %2735 = vmatmul.mubr.msk.f32.gmra.mxu0 %vm100_vm1, %v44_v16  ;;  %v986_v18 = vpop.permute.xlu0 %985 }
  0xe9   :  { %v997_v2 = vsel %vm993_vm7, %v984_v13, %v986_v18  ;;  %1208 = vmatprep.mubr.f32.mxu0 %v2853_v9 }
  0xea   :  { %1043 = vmatprep.subr.mxu1 %v997_v2 }
  0xec   :  { %v982_v19 = vpop.permute.xlu1 %981 }
  0xed   :  { %v996_v20 = vsel %vm993_vm7, %v982_v19, %v984_v13  ;;  %v1121_v0 = vpop.permute.xlu0 %1120 }
  0xee   :  { %1044 = vmatpush1.msra.mxu1 %v996_v20  ;;  %v1128_v4 = vsel %vm1122_vm8, %v1119_v17, %v1121_v0 }
  0xef   :  { %1170 = vmatprep.subr.mxu0 %v1128_v4 }
  0xf0   :  { %v978_v3 = vpop.permute.xlu1 %977 }
  0xf1   :  { %v1117_v21 = vpop.permute.xlu0 %1116 }
  0xf2   :  { %v1127_v22 = vsel %vm1122_vm8, %v1117_v21, %v1119_v17 }
  0xf3   :  { %1171 = vmatpush1.msra.mxu0 %v1127_v22 }
  0xf4   :  { %v1113_v6 = vpop.permute.xlu1 %1112 }
  0xf5   :  { %v980_v7 = vpop.permute.xlu0 %979 }
  0xf6   :  { %v995_v23 = vsel %vm993_vm7, %v978_v3, %v980_v7 }
  0xf7   :  { %1045 = vmatprep.subr.mxu1 %v995_v23 }
  0xf8   :  { %v976_v24 = vpop.permute.xlu1 %975 }
  0xf9   :  { %v994_v26 = vsel %vm993_vm7, %v976_v24, %v978_v3  ;;  %v1115_v27 = vpop.permute.xlu0 %1114 }
  0xfa   :  { %1046 = vmatpush1.msra.mxu1 %v994_v26  ;;  %v1126_v28 = vsel %vm1122_vm8, %v1113_v6, %v1115_v27 }
  0xfb   :  { %1172 = vmatprep.subr.mxu0 %v1126_v28  ;;  %2736 = vmatmul.mubr.msk.f32.vlgmr.msra.gmra.mxu1 %vm100_vm1, %v45_v25 }
  0xfc   :  { %v1107_v29 = vpop.permute.xlu1 %1106  ;;  %1085 = vmatprep.mubr.f32.mxu1 %v2853_v9 }
  0xfd   :  { %v1111_v31 = vpop.permute.xlu0 %1110 }
  0xfe   :  { %v1125_v32 = vsel %vm1122_vm8, %v1111_v31, %v1113_v6 }
  0xff   :  { %1173 = vmatpush1.msra.mxu0 %v1125_v32  ;;  %2737 = vmatmul.mubr.msk.f32.gmra.mxu1 %vm100_vm1, %v46_v30 }
 0x100   :  { %v1105_v33 = vpop.permute.xlu1 %1104  ;;  %1091 = vmatprep.mubr.f32.mxu1 %v2853_v9 }
 0x101   :  { %v1123_v35 = vsel %vm1122_vm8, %v1105_v33, %v1107_v29  ;;  %v1109_v36 = vpop.permute.xlu0 %1108 }
 0x102   :  { %v1124_v37 = vsel %vm1122_vm8, %v1107_v29, %v1109_v36 }
 0x103   :  { %1174 = vmatprep.subr.mxu0 %v1124_v37  ;;  %2738 = vmatmul.mubr.msk.f32.gmra.mxu1 %vm100_vm1, %v47_v34 }
 0x104   :  { %1175 = vmatpush1.msra.mxu0 %v1123_v35  ;;  %1527 = vmatprep.mubr.f32.mxu1 %v2853_v9 }
 0x105   :  { %2739 = vmatmul.mubr.msk.f32.vlgmr.msra.gmra.mxu0 %vm100_vm1, %v48_v38 }
 0x106   :  { %1214 = vmatprep.mubr.f32.mxu0 %v2853_v9 }
 0x109   :  { %2740 = vmatmul.mubr.msk.f32.gmra.mxu0 %vm100_vm1, %v49_v39 }
 0x10a   :  { %1220 = vmatprep.mubr.f32.mxu0 %v2853_v9 }
 0x10d   :  { %2741 = vmatmul.mubr.msk.f32.gmra.mxu0 %vm100_vm1, %v50_v41  ;;  %v201_v13 = vpop.permute.xlu1 %200  ;;  %v1234_v41 = vlaneseq }
 0x10e   :  { %1667 = vmatprep.mubr.f32.mxu0 %v2853_v9  ;;  %v206_v22 = vpop.permute.xlu0 %205 }
 0x112   :  { %v196_v17 = vpop.permute.xlu1 %195 }
 0x147   :  { %v176_v42 = vpop.f32.mrf.mxu0 }
 0x148   :  { %v208_v19 = vadd.f32 %v196_v17, %v176_v42 }
 0x149   :  { %v178_v44 = vpop.f32.mrf.mxu0 }
 0x14a   :  { %v209_v3 = vadd.f32 %v196_v17, %v178_v44 }
 0x14c   :  { %v182_v45 = vpop.f32.mrf.mxu0 }
 0x14d   :  { %v210_v4 = vadd.f32 %v201_v13, %v182_v45 }
 0x14e   :  { %v184_v46 = vpop.f32.mrf.mxu0 }
 0x14f   :  { %v211_v24 = vadd.f32 %v201_v13, %v184_v46 }
 0x150   :  { %v188_v49 = vpop.f32.mrf.mxu0 }
 0x151   :  { %v212_v7 = vadd.f32 %v206_v22, %v188_v49 }
 0x152   :  { %v190_v51 = vpop.f32.mrf.mxu0 }
 0x153   :  { %v213_v29 = vadd.f32 %v206_v22, %v190_v51 }
 0x163   :  { %v320_v48 = vpop.f32.mrf.mxu1 }
 0x164   :  { %v337_v21 = vadd.f32 %v320_v48, %v208_v19 }
 0x165   :  { %v322_v50 = vpop.f32.mrf.mxu1 }
 0x166   :  { %v338_v25 = vadd.f32 %v322_v50, %v209_v3 }
 0x167   :  { %v326_v52 = vpop.f32.mrf.mxu1 }
 0x168   :  { %v339_v26 = vadd.f32 %v326_v52, %v210_v4 }
 0x169   :  { %v328_v54 = vpop.f32.mrf.mxu1 }
 0x16a   :  { %v340_v34 = vadd.f32 %v328_v54, %v211_v24 }
 0x16b   :  { %v449_v53 = vpop.f32.mrf.mxu0  ;;  %v332_v56 = vpop.f32.mrf.mxu1 }
 0x16c   :  { %v466_v27 = vadd.f32 %v449_v53, %v337_v21  ;;  %v341_v30 = vadd.f32 %v332_v56, %v212_v7  ;;  %v1235_v53 = vshrl.u32 %v1234_v41, 7 }
 0x16d   :  { %v451_v55 = vpop.f32.mrf.mxu0  ;;  %v334_v58 = vpop.f32.mrf.mxu1 }
 0x16e   :  { %v467_v35 = vadd.f32 %v451_v55, %v338_v25  ;;  %v342_v37 = vadd.f32 %v334_v58, %v213_v29  ;;  %v1236_v17 = vsub.s32 0, %v1235_v53  ;;  %v1240_v19 = vsub.s32 1, %v1235_v53 }
 0x16f   :  { %v455_v57 = vpop.f32.mrf.mxu0 }
 0x170   :  { %v468_v32 = vadd.f32 %v455_v57, %v339_v26 }
 0x171   :  { %v457_v59 = vpop.f32.mrf.mxu0 }
 0x172   :  { %v469_v45 = vadd.f32 %v457_v59, %v340_v34 }
 0x173   :  { %v461_v61 = vpop.f32.mrf.mxu0 }
 0x174   :  { %v470_v38 = vadd.f32 %v461_v61, %v341_v30 }
 0x175   :  { %v463_v63 = vpop.f32.mrf.mxu0 }
 0x176   :  { %v471_v50 = vadd.f32 %v463_v63, %v342_v37  ;;  %v20_v63 = vld [vmem:[%s3893_s1] sm:$0x3] }
 0x177   :  { %v676_v5 = vpop.f32.mrf.mxu0  ;;  %v3282_v21 = vrot.slane %v20_v63, %v1236_v17 }
 0x179   :  { %v678_v10 = vpop.f32.mrf.mxu0 }
 0x17b   :  { %v682_v12 = vpop.f32.mrf.mxu0 }
 0x17c   :  { %v578_v60 = vpop.f32.mrf.mxu1 }
 0x17d   :  { %v684_v15 = vpop.f32.mrf.mxu0  ;;  %v595_v33 = vadd.f32 %v578_v60, %v466_v27 }
 0x17e   :  { %v580_v62 = vpop.f32.mrf.mxu1 }
 0x17f   :  { %v688_v18 = vpop.f32.mrf.mxu0  ;;  %v693_v44 = vadd.f32 %v676_v5, %v595_v33  ;;  %v596_v46 = vadd.f32 %v580_v62, %v467_v35 }
 0x180   :  { %v584_v1 = vpop.f32.mrf.mxu1 }
 0x181   :  { %v690_v20 = vpop.f32.mrf.mxu0  ;;  %v597_v42 = vadd.f32 %v584_v1, %v468_v32  ;;  %v694_v57 = vadd.f32 %v678_v10, %v596_v46 }
 0x182   :  { %v586_v8 = vpop.f32.mrf.mxu1 }
 0x183   :  { %v598_v56 = vadd.f32 %v586_v8, %v469_v45  ;;  %v695_v60 = vadd.f32 %v682_v12, %v597_v42 }
 0x184   :  { %v590_v11 = vpop.f32.mrf.mxu1 }
 0x185   :  { %v599_v52 = vadd.f32 %v590_v11, %v470_v38  ;;  %v696_v1 = vadd.f32 %v684_v15, %v598_v56 }
 0x186   :  { %v592_v14 = vpop.f32.mrf.mxu1 }
 0x187   :  { %v600_v58 = vadd.f32 %v592_v14, %v471_v50  ;;  %v697_v61 = vadd.f32 %v688_v18, %v599_v52  ;;  %v3284_v14 = vrot.slane %v20_v63, %v1240_v19 }
 0x189   :  { %v698_v12 = vadd.f32 %v690_v20, %v600_v58  ;;  %v2861_v58 = vmov 1  }
 0x18a   :  { %2787 = vset.pattern.permute.xlu0 %v2861_v58  ;;  %2786 = vset.pattern.permute.xlu1 %v2861_v58 }
 0x197   :  { %v823_v16 = vpop.f32.mrf.mxu1 }
 0x198   :  { %v840_v54 = vadd.f32 %v823_v16, %v693_v44 }
 0x199   :  { %v825_v2 = vpop.f32.mrf.mxu1 }
 0x19a   :  { %v841_v5 = vadd.f32 %v825_v2, %v694_v57 }
 0x19b   :  { %v829_v0 = vpop.f32.mrf.mxu1 }
 0x19c   :  { %v842_v59 = vadd.f32 %v829_v0, %v695_v60 }
 0x19d   :  { %v831_v23 = vpop.f32.mrf.mxu1 }
 0x19e   :  { %v843_v18 = vadd.f32 %v831_v23, %v696_v1 }
 0x19f   :  { %v835_v31 = vpop.f32.mrf.mxu1 }
 0x1a0   :  { %v952_v6 = vpop.f32.mrf.mxu0  ;;  %v844_v16 = vadd.f32 %v835_v31, %v697_v61 }
 0x1a1   :  { %v837_v39 = vpop.f32.mrf.mxu1  ;;  %v969_v62 = vadd.f32 %v952_v6, %v840_v54 }
 0x1a2   :  { %v954_v28 = vpop.f32.mrf.mxu0  ;;  %v845_v26 = vadd.f32 %v837_v39, %v698_v12 }
 0x1a3   :  { %v970_v8 = vadd.f32 %v954_v28, %v841_v5 }
 0x1a4   :  { %v958_v36 = vpop.f32.mrf.mxu0 }
 0x1a5   :  { %v971_v15 = vadd.f32 %v958_v36, %v842_v59 }
 0x1a6   :  { %v960_v48 = vpop.f32.mrf.mxu0 }
 0x1a7   :  { %v972_v7 = vadd.f32 %v960_v48, %v843_v18 }
 0x1a8   :  { %v964_v55 = vpop.f32.mrf.mxu0 }
 0x1a9   :  { %v973_v27 = vadd.f32 %v964_v55, %v844_v16 }
 0x1aa   :  { %v966_v11 = vpop.f32.mrf.mxu0 }
 0x1ab   :  { %v974_v33 = vadd.f32 %v966_v11, %v845_v26 }
 0x1bb   :  { %v1081_v49 = vpop.f32.mrf.mxu1 }
 0x1bc   :  { %v1098_v10 = vadd.f32 %v1081_v49, %v969_v62 }
 0x1bd   :  { %v1083_v51 = vpop.f32.mrf.mxu1 }
 0x1be   :  { %v1099_v2 = vadd.f32 %v1083_v51, %v970_v8 }
 0x1bf   :  { %v1087_v13 = vpop.f32.mrf.mxu1 }
 0x1c0   :  { %v1100_v24 = vadd.f32 %v1087_v13, %v971_v15 }
 0x1c1   :  { %v1089_v4 = vpop.f32.mrf.mxu1 }
 0x1c2   :  { %v1101_v28 = vadd.f32 %v1089_v4, %v972_v7 }
 0x1c3   :  { %v1093_v22 = vpop.f32.mrf.mxu1 }
 0x1c4   :  { %v1102_v34 = vadd.f32 %v1093_v22, %v973_v27 }
 0x1c5   :  { %v1210_v3 = vpop.f32.mrf.mxu0  ;;  %v1095_v31 = vpop.f32.mrf.mxu1 }
 0x1c6   :  { %v3286_v0 = vadd.f32 %v1210_v3, %v1098_v10  ;;  %v1103_v38 = vadd.f32 %v1095_v31, %v974_v33  ;;  %v2862_v33 = vmov 2  }
 0x1c7   :  { %v1212_v6 = vpop.f32.mrf.mxu0 }
 0x1c8   :  { %v3288_v25 = vadd.f32 %v1212_v6, %v1099_v2  ;;  %v1244_v30 = vmul.f32 %v3282_v21, %v3286_v0 }
 0x1c9   :  { %v1216_v20 = vpop.f32.mrf.mxu0 }
 0x1ca   :  { %v3290_v29 = vadd.f32 %v1216_v20, %v1100_v24  ;;  %v1245_v23 = vmul.f32 %v3284_v14, %v3288_v25  ;;  %v1259_v55 = vmul.f32 %v1244_v30, %v3286_v0 }
 0x1cb   :  { %v1218_v32 = vpop.f32.mrf.mxu0 }
 0x1cc   :  { %v3296_v35 = vadd.f32 %v1218_v32, %v1101_v28  ;;  %v1250_v36 = vadd.f32 %v1245_v23, %v1244_v30  ;;  %v1246_v41 = vmul.f32 %v3282_v21, %v3290_v29  ;;  %v1260_v54 = vmul.f32 %v1245_v23, %v3288_v25 }
 0x1cd   :  { %v1222_v37 = vpop.f32.mrf.mxu0 }
 0x1ce   :  { %v3298_v39 = vadd.f32 %v1222_v37, %v1102_v34  ;;  %1251 = vadd.xlane.f32.xlu0 %v1250_v36  ;;  %v1247_v42 = vmul.f32 %v3284_v14, %v3296_v35  ;;  %v1261_v49 = vmul.f32 %v1246_v41, %v3290_v29  ;;  %v1265_v13 = vadd.f32 %v1260_v54, %v1259_v55 }
 0x1cf   :  { %v1224_v44 = vpop.f32.mrf.mxu0 }
 0x1d0   :  { %v3304_v45 = vadd.f32 %v1224_v44, %v1103_v38  ;;  %v1253_v46 = vadd.f32 %v1247_v42, %v1246_v41  ;;  %v1262_v48 = vmul.f32 %v1247_v42, %v3296_v35  ;;  %v1248_v50 = vmul.f32 %v3282_v21, %v3298_v39 }
 0x1d2   :  { %1254 = vadd.xlane.f32.xlu1 %v1253_v46  ;;  %v1249_v52 = vmul.f32 %v3284_v14, %v3304_v45  ;;  %v1268_v51 = vadd.f32 %v1262_v48, %v1261_v49  ;;  %v1263_v57 = vmul.f32 %v1248_v50, %v3298_v39 }
 0x1d4   :  { %v1256_v53 = vadd.f32 %v1249_v52, %v1248_v50  ;;  %v1264_v56 = vmul.f32 %v1249_v52, %v3304_v45 }
 0x1d6   :  { %1269 = vadd.xlane.f32.xlu1 %v1268_v51  ;;  %1257 = vadd.xlane.f32.xlu0 %v1256_v53  ;;  %v1271_v60 = vadd.f32 %v1264_v56, %v1263_v57 }
 0x1da   :  { %1272 = vadd.xlane.f32.xlu0 %v1271_v60 }
 0x1de   :  { %1266 = vadd.xlane.f32.xlu0 %v1265_v13 }
 0x257   :  { %v1252_v61 = vpop.xlane.xlu0 %1251 }
 0x258   :  { %v1274_v8 = vmul.f32 0.0078125, %v1252_v61 }
 0x25a   :  { %v1280_v15 = vmul.f32 %v1274_v8, %v1274_v8 }
 0x25b   :  { %v1255_v17 = vpop.xlane.xlu1 %1254 }
 0x25c   :  { %v1275_v19 = vmul.f32 0.0078125, %v1255_v17 }
 0x25e   :  { %v1281_v59 = vmul.f32 %v1275_v19, %v1275_v19 }
 0x25f   :  { %v1270_v1 = vpop.xlane.xlu1 %1269  ;;  %v1258_v5 = vpop.xlane.xlu0 %1257 }
 0x260   :  { %v1278_v62 = vmul.f32 0.0078125, %v1270_v1  ;;  %v1276_v63 = vmul.f32 0.0078125, %v1258_v5 }
 0x262   :  { %v1284_v11 = vsub.f32 %v1278_v62, %v1281_v59  ;;  %v1282_v12 = vmul.f32 %v1276_v63, %v1276_v63 }
 0x263   :  { %v1273_v4 = vpop.xlane.xlu0 %1272 }
 0x264   :  { %v1287_v10 = vadd.f32 1e-05, %v1284_v11  ;;  %v1279_v16 = vmul.f32 0.0078125, %v1273_v4 }
 0x266   :  { %2836 = vrsqrt.f32 %v1287_v10  ;;  %v1285_v3 = vsub.f32 %v1279_v16, %v1282_v12 }
 0x267   :  { %v1267_v18 = vpop.xlane.xlu0 %1266 }
 0x268   :  { %v1288_v2 = vadd.f32 1e-05, %v1285_v3  ;;  %v1277_v22 = vmul.f32 0.0078125, %v1267_v18  ;;  %v2863_v18 = vmov 3  }
 0x26a   :  { %2838 = vrsqrt.f32 %v1288_v2  ;;  %v1283_v6 = vsub.f32 %v1277_v22, %v1280_v15  ;;  %v3500_v22 = vld [vmem:[%s3892_s4 + $0x8] sm:$0xff] }
 0x26c   :  { %v1286_v7 = vadd.f32 1e-05, %v1283_v6  ;;  %v3506_v6 = vld [vmem:[%s3892_s4] sm:$0xff] }
 0x26e   :  { %2840 = vrsqrt.f32 %v1286_v7 }
 0x273   :  { %v2837_v24 = vpop.eup %2836 }
 0x274   :  { %v1293_v26 = vmul.f32 %v2837_v24, %v3097_v40 }
 0x276   :  { %v1296_v27 = vmul.f32 %v1293_v26, %v1275_v19 }
 0x277   :  { %v2839_v20 = vpop.eup %2838 }
 0x278   :  { %1303 = vrot.lane.b32.xlu0 %v1296_v27, %s2855_s14  ;;  %v1294_v28 = vmul.f32 %v2839_v20, %v3103_v43 }
 0x27a   :  { %v1297_v30 = vmul.f32 %v1294_v28, %v1276_v63 }
 0x27b   :  { %v2841_v23 = vpop.eup %2840 }
 0x27c   :  { %1320 = vperm.xlu0 %2787, %v1293_v26   ;;  %1305 = vrot.lane.b32.xlu1 %v1297_v30, %s2855_s14  ;;  %v1292_v31 = vmul.f32 %v2841_v23, %v3112_v47  ;;  %v3512_v26 = vld [vmem:[%s3892_s4 + $0x10] sm:$0xff] }
 0x27e   :  { %v1295_v32 = vmul.f32 %v1292_v31, %v1274_v8 }
 0x280   :  { %1301 = vrot.lane.b32.xlu1 %v1295_v32, %s2855_s14  ;;  %1424 = vrot.lane.b32.xlu0 %v2853_v9, %s2851_s22 }
 0x281   :  { %2794 = vset.pattern.permute.xlu0 %v2862_v33 }
 0x284   :  { %1325 = vperm.xlu1 %2786, %v1294_v28  }
 0x288   :  { %1315 = vperm.xlu1 %2786, %v1292_v31  }
 0x28c   :  { %2789 = vrot.lane.b32.xlu1 %v2853_v9, %s2851_s22 }
 0x28d   :  { %2793 = vset.pattern.permute.xlu1 %v2862_v33 }
 0x2ea   :  { %v1304_v34 = vpop.permute.xlu0 %1303 }
 0x2eb   :  { %v1311_v36 = vsub.f32 %v3097_v40, %v1304_v34 }
 0x2ed   :  { %1341 = vperm.xlu0 %2794, %v1311_v36  }
 0x2ee   :  { %v1306_v37 = vpop.permute.xlu1 %1305 }
 0x2ef   :  { %v1312_v42 = vsub.f32 %v3103_v43, %v1306_v37 }
 0x2f1   :  { %2801 = vrot.lane.b32.xlu0 %v2853_v9, %s2854_s13 }
 0x2f2   :  { %v1302_v38 = vpop.permute.xlu1 %1301  ;;  %2831 = vset.pattern.permute.xlu0 %v2863_v18 }
 0x2f3   :  { %v1310_v41 = vsub.f32 %v3112_v47, %v1302_v38 }
 0x2f5   :  { %1336 = vperm.xlu1 %2793, %v1310_v41   ;;  %1692 = vrot.lane.b32.xlu0 %v2853_v9, %s2854_s13 }
 0x2f7   :  { %v1321_v53 = vpop.permute.xlu0 %1320 }
 0x2f8   :  { %v1330_v60 = vmul.f32 %v1321_v53, %v3290_v29  ;;  %v1331_v54 = vmul.f32 %v1321_v53, %v3296_v35 }
 0x2f9   :  { %1346 = vperm.xlu1 %2793, %v1312_v42   ;;  %1820 = vrot.lane.b32.xlu0 %v2853_v9, %s2855_s14 }
 0x2fd   :  { %2796 = vrot.lane.b32.xlu1 %v2853_v9, %s2852_s12  ;;  %2811 = vrot.lane.b32.xlu0 %v2853_v9, %s2856_s17 }
 0x2fe   :  { %2830 = vset.pattern.permute.xlu1 %v2863_v18 }
 0x2ff   :  { %v1326_v40 = vpop.permute.xlu1 %1325 }
 0x300   :  { %v1333_v19 = vmul.f32 %v1326_v40, %v3304_v45  ;;  %v1332_v59 = vmul.f32 %v1326_v40, %v3298_v39 }
 0x301   :  { %1564 = vrot.lane.b32.xlu1 %v2853_v9, %s2852_s12  ;;  %2816 = vrot.lane.b32.xlu0 %v2853_v9, %s2857_s20 }
 0x303   :  { %v1316_v43 = vpop.permute.xlu1 %1315 }
 0x304   :  { %v1328_v44 = vmul.f32 %v1316_v43, %v3286_v0  ;;  %v1329_v46 = vmul.f32 %v1316_v43, %v3288_v25  ;;  %v3361_v0 = vpop.permute.xlu0 %1424 }
 0x305   :  { %2806 = vrot.lane.b32.xlu1 %v2853_v9, %s2855_s14  ;;  %2068 = vrot.lane.b32.xlu0 %v2853_v9, %s2856_s17 }
 0x307   :  { %v3347_v47 = vpop.permute.xlu1 %2789 }
 0x368   :  { %v1342_v25 = vpop.permute.xlu0 %1341 }
 0x369   :  { %v1351_v55 = vadd.f32 %v1342_v25, %v1330_v60  ;;  %v1352_v13 = vadd.f32 %v1342_v25, %v1331_v54  ;;  %v2791_v25 = vunpack.i.l.bf16 %v3347_v47 }
 0x36b   :  { %v1357_v58 = vmax.f32 %v1351_v55, 0.0  ;;  %v1358_v61 = vmax.f32 %v1352_v13, 0.0 }
 0x36c   :  { %v3455_v11 = vpop.permute.xlu0 %2801 }
 0x36d   :  { %v3382_v29 = vmul.f32 %v1357_v58, %v3282_v21  ;;  %v3385_v35 = vmul.f32 %v1358_v61, %v3284_v14  ;;  %v2792_v58 = vunpack.i.h.bf16 %v3347_v47 }
 0x370   :  { %v1337_v48 = vpop.permute.xlu1 %1336  ;;  %v3465_v4 = vpop.permute.xlu0 %1692 }
 0x371   :  { %v1349_v49 = vadd.f32 %v1337_v48, %v1328_v44  ;;  %v1350_v50 = vadd.f32 %v1337_v48, %v1329_v46 }
 0x373   :  { %v1355_v52 = vmax.f32 %v1349_v49, 0.0  ;;  %v1356_v51 = vmax.f32 %v1350_v50, 0.0 }
 0x374   :  { %v1347_v17 = vpop.permute.xlu1 %1346  ;;  %v3471_v8 = vpop.permute.xlu0 %1820 }
 0x375   :  { %v3352_v56 = vmul.f32 %v1355_v52, %v3282_v21  ;;  %v3355_v57 = vmul.f32 %v1356_v51, %v3284_v14  ;;  %v1354_v1 = vadd.f32 %v1347_v17, %v1333_v19  ;;  %v1353_v45 = vadd.f32 %v1347_v17, %v1332_v59  ;;  %v1379_v59 = vld [vmem:[%s3894_s3] sm:$0xff] }
 0x377   :  { %1428 = vrot.lane.b32.xlu1 %v3355_v57, %s2851_s22  ;;  %1426 = vrot.lane.b32.xlu0 %v3352_v56, %s2851_s22  ;;  %v1360_v5 = vmax.f32 %v1354_v1, 0.0  ;;  %v1359_v63 = vmax.f32 %v1353_v45, 0.0 }
 0x378   :  { %v3481_v10 = vpop.permute.xlu1 %2796  ;;  %v3483_v12 = vpop.permute.xlu0 %2811 }
 0x379   :  { %v3410_v62 = vmul.f32 %v1360_v5, %v3284_v14  ;;  %v3421_v39 = vmul.f32 %v1359_v63, %v3282_v21  ;;  %v2798_v45 = vunpack.i.l.bf16 %v3481_v10 }
 0x37b   :  { %1566 = vrot.lane.b32.xlu1 %v3352_v56, %s2852_s12  ;;  %1568 = vrot.lane.b32.xlu0 %v3355_v57, %s2852_s12 }
 0x37c   :  { %v3487_v16 = vpop.permute.xlu1 %1564  ;;  %v3489_v3 = vpop.permute.xlu0 %2816 }
 0x37f   :  { %1696 = vrot.lane.b32.xlu1 %v3355_v57, %s2854_s13  ;;  %1694 = vrot.lane.b32.xlu0 %v3352_v56, %s2854_s13 }
 0x380   :  { %v3495_v15 = vpop.permute.xlu1 %2806  ;;  %v2069_v2 = vpop.permute.xlu0 %2068 }
 0x383   :  { %1824 = vrot.lane.b32.xlu1 %v3355_v57, %s2855_s14  ;;  %1822 = vrot.lane.b32.xlu0 %v3352_v56, %s2855_s14 }
 0x387   :  { %2066 = vrot.lane.b32.xlu1 %v3355_v57, %s2856_s17  ;;  %2064 = vrot.lane.b32.xlu0 %v3352_v56, %s2856_s17 }
 0x38b   :  { %1434 = vrot.lane.b32.xlu1 %v3385_v35, %s2851_s22  ;;  %1432 = vrot.lane.b32.xlu0 %v3382_v29, %s2851_s22 }
 0x38f   :  { %1574 = vrot.lane.b32.xlu1 %v3385_v35, %s2852_s12  ;;  %1572 = vrot.lane.b32.xlu0 %v3382_v29, %s2852_s12 }
 0x393   :  { %1700 = vrot.lane.b32.xlu1 %v3382_v29, %s2854_s13  ;;  %1702 = vrot.lane.b32.xlu0 %v3385_v35, %s2854_s13 }
 0x397   :  { %1830 = vrot.lane.b32.xlu1 %v3385_v35, %s2855_s14  ;;  %1828 = vrot.lane.b32.xlu0 %v3382_v29, %s2855_s14 }
 0x39b   :  { %2070 = vrot.lane.b32.xlu1 %v3382_v29, %s2856_s17  ;;  %2072 = vrot.lane.b32.xlu0 %v3385_v35, %s2856_s17 }
 0x39f   :  { %2200 = vrot.lane.b32.xlu1 %v3385_v35, %s2857_s20  ;;  %1440 = vrot.lane.b32.xlu0 %v3410_v62, %s2851_s22 }
 0x3a3   :  { %2198 = vrot.lane.b32.xlu1 %v3382_v29, %s2857_s20  ;;  %2194 = vrot.lane.b32.xlu0 %v3355_v57, %s2857_s20 }
 0x3a7   :  { %1438 = vrot.lane.b32.xlu1 %v3421_v39, %s2851_s22  ;;  %1580 = vrot.lane.b32.xlu0 %v3410_v62, %s2852_s12 }
 0x3ab   :  { %2196 = vrot.lane.b32.xlu1 %v2853_v9, %s2857_s20  ;;  %1706 = vrot.lane.b32.xlu0 %v3421_v39, %s2854_s13 }
 0x3af   :  { %1578 = vrot.lane.b32.xlu1 %v3421_v39, %s2852_s12  ;;  %2192 = vrot.lane.b32.xlu0 %v3352_v56, %s2857_s20 }
 0x3b3   :  { %1708 = vrot.lane.b32.xlu1 %v3410_v62, %s2854_s13  ;;  %2821 = vrot.lane.b32.xlu0 %v2853_v9, %s2858_s24 }
 0x3b7   :  { %1834 = vrot.lane.b32.xlu1 %v3421_v39, %s2855_s14  ;;  %1836 = vrot.lane.b32.xlu0 %v3410_v62, %s2855_s14 }
 0x3bb   :  { %2326 = vrot.lane.b32.xlu1 %v3382_v29, %s2858_s24  ;;  %2328 = vrot.lane.b32.xlu0 %v3385_v35, %s2858_s24 }
 0x3bf   :  { %2322 = vrot.lane.b32.xlu1 %v3355_v57, %s2858_s24  ;;  %2826 = vrot.lane.b32.xlu0 %v2853_v9, %s2859_s25 }
 0x3c3   :  { %2456 = vrot.lane.b32.xlu1 %v3385_v35, %s2859_s25  ;;  %2324 = vrot.lane.b32.xlu0 %v2853_v9, %s2858_s24 }
 0x3c7   :  { %2078 = vrot.lane.b32.xlu1 %v3410_v62, %s2856_s17  ;;  %2204 = vrot.lane.b32.xlu0 %v3421_v39, %s2857_s20 }
 0x3cb   :  { %2076 = vrot.lane.b32.xlu1 %v3421_v39, %s2856_s17  ;;  %2320 = vrot.lane.b32.xlu0 %v3352_v56, %s2858_s24 }
 0x3cf   :  { %2206 = vrot.lane.b32.xlu1 %v3410_v62, %s2857_s20  ;;  %2450 = vrot.lane.b32.xlu0 %v3355_v57, %s2859_s25 }
 0x3d3   :  { %2454 = vrot.lane.b32.xlu1 %v3382_v29, %s2859_s25  ;;  %2460 = vrot.lane.b32.xlu0 %v3421_v39, %s2859_s25 }
 0x3d7   :  { %2334 = vrot.lane.b32.xlu1 %v3410_v62, %s2858_s24  ;;  %2448 = vrot.lane.b32.xlu0 %v3352_v56, %s2859_s25 }
 0x3db   :  { %2332 = vrot.lane.b32.xlu1 %v3421_v39, %s2858_s24  ;;  %1551 = vperm.xlu0 %2831, %v3500_v22  }
 0x3df   :  { %2462 = vrot.lane.b32.xlu1 %v3410_v62, %s2859_s25 }
 0x3e3   :  { %2452 = vrot.lane.b32.xlu1 %v2853_v9, %s2859_s25 }
 0x3e7   :  { %1547 = vperm.xlu1 %2830, %v3506_v6  }
 0x3e9   :  { %v1429_v7 = vpop.permute.xlu1 %1428  ;;  %v1427_v24 = vpop.permute.xlu0 %1426 }
 0x3ea   :  { %v1443_v5 = vsel %vm87_vm0, %v1427_v24, %v1429_v7  ;;  %v1442_v47 = vsel %vm87_vm0, %v3361_v0, %v1427_v24  ;;  %v2799_v0 = vunpack.i.h.bf16 %v3481_v10 }
 0x3eb   :  { %1555 = vperm.xlu1 %2830, %v3512_v26  }
 0x3ed   :  { %v3515_v27 = vpop.permute.xlu1 %1566  ;;  %v3517_v20 = vpop.permute.xlu0 %1568 }
 0x3f1   :  { %v3519_v28 = vpop.permute.xlu1 %1696  ;;  %v3521_v30 = vpop.permute.xlu0 %1694 }
 0x3f5   :  { %v3523_v23 = vpop.permute.xlu1 %1824  ;;  %v3525_v31 = vpop.permute.xlu0 %1822 }
 0x3f9   :  { %v2067_v32 = vpop.permute.xlu1 %2066  ;;  %v2065_v33 = vpop.permute.xlu0 %2064 }
 0x3fa   :  { %v3528_v34 = vsel %vm735_vm5, %v2065_v33, %v2067_v32  ;;  %v3531_v36 = vsel %vm735_vm5, %v2067_v32, %v2069_v2  ;;  %v1380_v32 = vld [vmem:[%s3894_s3 + $0x8] sm:$0xff]  ;;  %v2803_v33 = vunpack.i.l.bf16 %v3455_v11 }
 0x3fd   :  { %v1435_v37 = vpop.permute.xlu1 %1434  ;;  %v1433_v38 = vpop.permute.xlu0 %1432 }
 0x3fe   :  { %v1445_v61 = vsel %vm87_vm0, %v1433_v38, %v1435_v37  ;;  %v1444_v17 = vsel %vm87_vm0, %v2792_v58, %v1433_v38 }
 0x401   :  { %v1575_v41 = vpop.permute.xlu1 %1574  ;;  %v1573_v42 = vpop.permute.xlu0 %1572 }
 0x402   :  { %v1585_v24 = vsel %vm232_vm2, %v1573_v42, %v1575_v41  ;;  %v1584_v37 = vsel %vm232_vm2, %v2799_v0, %v1573_v42  ;;  %v1381_v41 = vld [vmem:[%s3894_s3 + $0x10] sm:$0xff]  ;;  %v1382_v42 = vld [vmem:[%s3894_s3 + $0x18] sm:$0xff]  ;;  %v1392_v0 = vld [vmem:[%s3894_s3 + $0x68] sm:$0xff] }
 0x405   :  { %v3533_v40 = vpop.permute.xlu1 %1700  ;;  %v3535_v43 = vpop.permute.xlu0 %1702 }
 0x409   :  { %v3537_v44 = vpop.permute.xlu1 %1830  ;;  %v3539_v46 = vpop.permute.xlu0 %1828 }
 0x40d   :  { %v3541_v48 = vpop.permute.xlu1 %2070  ;;  %v3543_v49 = vpop.permute.xlu0 %2072 }
 0x411   :  { %v3545_v50 = vpop.permute.xlu1 %2200  ;;  %v1441_v52 = vpop.permute.xlu0 %1440 }
 0x415   :  { %v3547_v51 = vpop.permute.xlu1 %2198  ;;  %v3549_v53 = vpop.permute.xlu0 %2194 }
 0x419   :  { %v1439_v60 = vpop.permute.xlu1 %1438  ;;  %v1581_v54 = vpop.permute.xlu0 %1580 }
 0x41a   :  { %v1446_v55 = vsel %vm87_vm0, %v2791_v25, %v1439_v60  ;;  %v1447_v13 = vsel %vm87_vm0, %v1439_v60, %v1441_v52  ;;  %v1583_v25 = vsel %vm232_vm2, %v3515_v27, %v3517_v20  ;;  %v1582_v60 = vsel %vm232_vm2, %v3487_v16, %v3515_v27 }
 0x41b   :  { %1489 = vmatprep.subr.mxu1 %v1447_v13  ;;  %v2804_v20 = vunpack.i.h.bf16 %v3455_v11  ;;  %v1713_v16 = vsel %vm361_vm3, %v3533_v40, %v3535_v43  ;;  %v1383_v43 = vld [vmem:[%s3894_s3 + $0x20] sm:$0xff] }
 0x41c   :  { %1490 = vmatpush1.msra.mxu1 %v1446_v55  ;;  %v2808_v55 = vunpack.i.l.bf16 %v3495_v15 }
 0x41d   :  { %v3557_v19 = vpop.permute.xlu1 %2196  ;;  %1491 = vmatprep.subr.mxu1 %v1445_v61  ;;  %v1707_v1 = vpop.permute.xlu0 %1706  ;;  %v1712_v27 = vsel %vm361_vm3, %v2804_v20, %v3533_v40  ;;  %v1710_v40 = vsel %vm361_vm3, %v3465_v4, %v3521_v30 }
 0x41e   :  { %1492 = vmatpush1.msra.mxu1 %v1444_v17  ;;  %v1711_v17 = vsel %vm361_vm3, %v3521_v30, %v3519_v28 }
 0x41f   :  { %1493 = vmatprep.subr.mxu1 %v1443_v5  ;;  %v2809_v5 = vunpack.i.h.bf16 %v3495_v15  ;;  %v1839_v15 = vsel %vm490_vm4, %v3525_v31, %v3523_v23  ;;  %v1387_v23 = vld [vmem:[%s3894_s3 + $0x40] sm:$0xff] }
 0x420   :  { %1494 = vmatpush1.msra.mxu1 %v1442_v47 }
 0x421   :  { %v1579_v63 = vpop.permute.xlu1 %1578  ;;  %2742 = vmatmul.mubr.msk.f32.vlgmr.msra.gmra.mxu1 %vm100_vm1, %v1379_v59  ;;  %v3567_v18 = vpop.permute.xlu0 %2192  ;;  %v1841_v59 = vsel %vm490_vm4, %v3539_v46, %v3537_v44  ;;  %v1840_v4 = vsel %vm490_vm4, %v2809_v5, %v3539_v46  ;;  %v1384_v44 = vld [vmem:[%s3894_s3 + $0x28] sm:$0xff] }
 0x422   :  { %v1586_v2 = vsel %vm232_vm2, %v2798_v45, %v1579_v63  ;;  %v1587_v7 = vsel %vm232_vm2, %v1579_v63, %v1581_v54  ;;  %1533 = vmatprep.mubr.f32.mxu1 %v2853_v9  ;;  %v1714_v54 = vsel %vm361_vm3, %v2803_v33, %v1707_v1  ;;  %v1389_v45 = vld [vmem:[%s3894_s3 + $0x50] sm:$0xff] }
 0x423   :  { %1629 = vmatprep.subr.mxu0 %v1587_v7 }
 0x424   :  { %1630 = vmatpush1.msra.mxu0 %v1586_v2 }
 0x425   :  { %v1709_v38 = vpop.permute.xlu1 %1708  ;;  %2743 = vmatmul.mubr.msk.f32.gmra.mxu1 %vm100_vm1, %v1380_v32  ;;  %1631 = vmatprep.subr.mxu0 %v1585_v24  ;;  %v3580_v52 = vpop.permute.xlu0 %2821  ;;  %v1390_v32 = vld [vmem:[%s3894_s3 + $0x58] sm:$0xff]  ;;  %v2814_v24 = vunpack.i.h.bf16 %v3483_v12 }
 0x426   :  { %1632 = vmatpush1.msra.mxu0 %v1584_v37  ;;  %v1715_v10 = vsel %vm361_vm3, %v1707_v1, %v1709_v38  ;;  %1539 = vmatprep.mubr.f32.mxu1 %v2853_v9  ;;  %v1385_v1 = vld [vmem:[%s3894_s3 + $0x30] sm:$0xff]  ;;  %v2818_v37 = vunpack.i.l.bf16 %v3489_v3 }
 0x427   :  { %1633 = vmatprep.subr.mxu0 %v1583_v25  ;;  %1757 = vmatprep.subr.mxu1 %v1715_v10  ;;  %v2085_v38 = vsel %vm735_vm5, %v3543_v49, %v2814_v24  ;;  %v2084_v25 = vsel %vm735_vm5, %v3541_v48, %v3543_v49  ;;  %v1393_v10 = vld [vmem:[%s3894_s3 + $0x70] sm:$0xff]  ;;  %v1394_v48 = vld [vmem:[%s3894_s3 + $0x78] sm:$0xff]  ;;  %v2819_v49 = vunpack.i.h.bf16 %v3489_v3  ;;  %v1395_v3 = vld [vmem:[%s3894_s3 + $0x80] sm:$0xff] }
 0x428   :  { %1634 = vmatpush1.msra.mxu0 %v1582_v60  ;;  %1758 = vmatpush1.msra.mxu1 %v1714_v54 }
 0x429   :  { %v1835_v13 = vpop.permute.xlu1 %1834  ;;  %2744 = vmatmul.mubr.msk.f32.gmra.mxu1 %vm100_vm1, %v1381_v41  ;;  %2745 = vmatmul.mubr.msk.f32.vlgmr.msra.gmra.mxu0 %vm100_vm1, %v1382_v42  ;;  %v1837_v58 = vpop.permute.xlu0 %1836  ;;  %v2213_v20 = vsel %vm864_vm6, %v3545_v50, %v2819_v49 }
 0x42a   :  { %v1842_v61 = vsel %vm490_vm4, %v2808_v55, %v1835_v13  ;;  %1759 = vmatprep.subr.mxu1 %v1713_v16  ;;  %v1843_v11 = vsel %vm490_vm4, %v1835_v13, %v1837_v58  ;;  %1673 = vmatprep.mubr.f32.mxu0 %v2853_v9  ;;  %v2212_v55 = vsel %vm864_vm6, %v3547_v51, %v3545_v50  ;;  %v2823_v51 = vunpack.i.l.bf16 %v3580_v52  ;;  %v1396_v16 = vld [vmem:[%s3894_s3 + $0x88] sm:$0xff] }
 0x42b   :  { %1760 = vmatpush1.msra.mxu1 %v1712_v27  ;;  %1885 = vmatprep.subr.mxu0 %v1843_v11  ;;  %v2210_v50 = vsel %vm864_vm6, %v3567_v18, %v3549_v53  ;;  %v1398_v18 = vld [vmem:[%s3894_s3 + $0x98] sm:$0xff] }
 0x42c   :  { %1761 = vmatprep.subr.mxu1 %v1711_v17  ;;  %1795 = vmatprep.mubr.f32.mxu1 %v2853_v9  ;;  %v1399_v17 = vld [vmem:[%s3894_s3 + $0xa0] sm:$0xff] }
 0x42d   :  { %1762 = vmatpush1.msra.mxu1 %v1710_v40  ;;  %1886 = vmatpush1.msra.mxu0 %v1842_v61  ;;  %v3623_v28 = vpop.permute.xlu1 %2326  ;;  %v3628_v47 = vpop.permute.xlu0 %2328 }
 0x42e   :  { %2746 = vmatmul.mubr.msk.f32.gmra.mxu0 %vm100_vm1, %v1383_v43  ;;  %1887 = vmatprep.subr.mxu0 %v1841_v59  ;;  %v2340_v43 = vsel %vm993_vm7, %v3623_v28, %v3628_v47 }
 0x42f   :  { %2748 = vmatmul.mubr.msk.f32.vlgmr.msra.gmra.mxu1 %vm100_vm1, %v1385_v1  ;;  %1983 = vmatprep.subr.mxu1 %v3410_v62  ;;  %v1386_v62 = vld [vmem:[%s3894_s3 + $0x38] sm:$0xff] }
 0x430   :  { %1888 = vmatpush1.msra.mxu0 %v1840_v4  ;;  %1984 = vmatpush1.msra.mxu1 %v3421_v39  ;;  %v1838_v39 = vsel %vm490_vm4, %v3471_v8, %v3525_v31  ;;  %v1388_v8 = vld [vmem:[%s3894_s3 + $0x48] sm:$0xff] }
 0x431   :  { %1889 = vmatprep.subr.mxu0 %v1839_v15  ;;  %1985 = vmatprep.subr.mxu1 %v3385_v35  ;;  %v3640_v30 = vpop.permute.xlu1 %2322  ;;  %v3645_v46 = vpop.permute.xlu0 %2826  ;;  %v1400_v4 = vld [vmem:[%s3894_s3 + $0xa8] sm:$0xff] }
 0x432   :  { %1679 = vmatprep.mubr.f32.mxu0 %v2853_v9  ;;  %1801 = vmatprep.mubr.f32.mxu1 %v2853_v9  ;;  %v2829_v40 = vunpack.i.h.bf16 %v3645_v46  ;;  %v2828_v1 = vunpack.i.l.bf16 %v3645_v46 }
 0x433   :  { %1890 = vmatpush1.msra.mxu0 %v1838_v39  ;;  %1986 = vmatpush1.msra.mxu1 %v3382_v29  ;;  %v1401_v39 = vld [vmem:[%s3894_s3 + $0xb0] sm:$0xff] }
 0x434   :  { %2747 = vmatmul.mubr.msk.f32.gmra.mxu0 %vm100_vm1, %v1384_v44  ;;  %2749 = vmatmul.mubr.msk.f32.gmra.mxu1 %vm100_vm1, %v1386_v62 }
 0x435   :  { %1987 = vmatprep.subr.mxu1 %v3355_v57  ;;  %1807 = vmatprep.mubr.f32.mxu1 %v2853_v9  ;;  %v3660_v35 = vpop.permute.xlu1 %2456  ;;  %v3670_v29 = vpop.permute.xlu0 %2324  ;;  %v2813_v57 = vunpack.i.l.bf16 %v3483_v12 }
 0x436   :  { %1988 = vmatpush1.msra.mxu1 %v3352_v56  ;;  %1923 = vmatprep.mubr.f32.mxu0 %v2853_v9  ;;  %v1391_v56 = vld [vmem:[%s3894_s3 + $0x60] sm:$0xff]  ;;  %v2339_v59 = vsel %vm993_vm7, %v3640_v30, %v3670_v29  ;;  %v2469_v46 = vsel %vm1122_vm8, %v3660_v35, %v2829_v40 }
 0x438   :  { %2751 = vmatmul.mubr.msk.f32.vlgmr.msra.gmra.mxu0 %vm100_vm1, %v1388_v8  ;;  %2750 = vmatmul.mubr.msk.f32.gmra.mxu1 %vm100_vm1, %v1387_v23  ;;  %v1403_v23 = vld [vmem:[%s3894_s3 + $0xc0] sm:$0xff] }
 0x439   :  { %1929 = vmatprep.mubr.f32.mxu0 %v2853_v9  ;;  %2021 = vmatprep.mubr.f32.mxu1 %v2853_v9  ;;  %v2079_v31 = vpop.permute.xlu1 %2078  ;;  %v2205_v2 = vpop.permute.xlu0 %2204 }
 0x43a   :  { %v2087_v63 = vsel %vm735_vm5, %v2079_v31, %v2813_v57  ;;  %v1404_v57 = vld [vmem:[%s3894_s3 + $0xc8] sm:$0xff] }
 0x43b   :  { %2129 = vmatprep.subr.mxu0 %v2087_v63 }
 0x43c   :  { %2752 = vmatmul.mubr.msk.f32.gmra.mxu0 %vm100_vm1, %v1389_v45  ;;  %2754 = vmatmul.mubr.msk.f32.vlgmr.msra.gmra.mxu1 %vm100_vm1, %v1391_v56 }
 0x43d   :  { %1935 = vmatprep.mubr.f32.mxu0 %v2853_v9  ;;  %2027 = vmatprep.mubr.f32.mxu1 %v2853_v9  ;;  %v2077_v7 = vpop.permute.xlu1 %2076  ;;  %v2321_v41 = vpop.permute.xlu0 %2320 }
 0x43e   :  { %v2086_v33 = vsel %vm735_vm5, %v2077_v7, %v2079_v31  ;;  %v2338_v15 = vsel %vm993_vm7, %v2321_v41, %v3640_v30  ;;  %v1405_v31 = vld [vmem:[%s3894_s3 + $0xd0] sm:$0xff] }
 0x43f   :  { %2130 = vmatpush1.msra.mxu0 %v2086_v33 }
 0x440   :  { %2753 = vmatmul.mubr.msk.f32.gmra.mxu0 %vm100_vm1, %v1390_v32  ;;  %2755 = vmatmul.mubr.msk.f32.gmra.mxu1 %vm100_vm1, %v1392_v0 }
 0x441   :  { %2033 = vmatprep.mubr.f32.mxu1 %v2853_v9  ;;  %2131 = vmatprep.subr.mxu0 %v2085_v38  ;;  %v2207_v12 = vpop.permute.xlu1 %2206  ;;  %v2451_v13 = vpop.permute.xlu0 %2450 }
 0x442   :  { %v2214_v42 = vsel %vm864_vm6, %v2205_v2, %v2207_v12  ;;  %2132 = vmatpush1.msra.mxu0 %v2084_v25  ;;  %2167 = vmatprep.mubr.f32.mxu0 %v2853_v9  ;;  %v2215_v60 = vsel %vm864_vm6, %v2207_v12, %v2818_v37 }
 0x443   :  { %2133 = vmatprep.subr.mxu0 %v3531_v36  ;;  %2257 = vmatprep.subr.mxu1 %v2215_v60  ;;  %v1397_v36 = vld [vmem:[%s3894_s3 + $0x90] sm:$0xff] }
 0x444   :  { %2756 = vmatmul.mubr.msk.f32.gmra.mxu1 %vm100_vm1, %v1393_v10  ;;  %2134 = vmatpush1.msra.mxu0 %v3528_v34  ;;  %v2211_v34 = vsel %vm864_vm6, %v3549_v53, %v3557_v19  ;;  %v2824_v53 = vunpack.i.h.bf16 %v3580_v52 }
 0x445   :  { %2757 = vmatmul.mubr.msk.f32.vlgmr.msra.gmra.mxu0 %vm100_vm1, %v1394_v48  ;;  %2258 = vmatpush1.msra.mxu1 %v2214_v42  ;;  %v2455_v54 = vpop.permute.xlu1 %2454  ;;  %v2461_v61 = vpop.permute.xlu0 %2460 }
 0x446   :  { %2259 = vmatprep.subr.mxu1 %v2213_v20  ;;  %2173 = vmatprep.mubr.f32.mxu0 %v2853_v9  ;;  %v2341_v52 = vsel %vm993_vm7, %v3628_v47, %v2824_v53  ;;  %v2468_v62 = vsel %vm1122_vm8, %v2455_v54, %v3660_v35  ;;  %v1402_v35 = vld [vmem:[%s3894_s3 + $0xb8] sm:$0xff] }
 0x447   :  { %2260 = vmatpush1.msra.mxu1 %v2212_v55  ;;  %2295 = vmatprep.mubr.f32.mxu1 %v2853_v9 }
 0x448   :  { %2261 = vmatprep.subr.mxu1 %v2211_v34 }
 0x449   :  { %2758 = vmatmul.mubr.msk.f32.gmra.mxu0 %vm100_vm1, %v1395_v3  ;;  %2262 = vmatpush1.msra.mxu1 %v2210_v50  ;;  %v2335_v58 = vpop.permute.xlu1 %2334  ;;  %v2449_v44 = vpop.permute.xlu0 %2448 }
 0x44a   :  { %2760 = vmatmul.mubr.msk.f32.vlgmr.msra.gmra.mxu1 %vm100_vm1, %v1397_v36  ;;  %2179 = vmatprep.mubr.f32.mxu0 %v2853_v9  ;;  %v2343_v19 = vsel %vm993_vm7, %v2335_v58, %v2823_v51  ;;  %v2466_v29 = vsel %vm1122_vm8, %v2449_v44, %v2451_v13 }
 0x44b   :  { %2385 = vmatprep.subr.mxu0 %v2343_v19  ;;  %2301 = vmatprep.mubr.f32.mxu1 %v2853_v9 }
 0x44d   :  { %2759 = vmatmul.mubr.msk.f32.gmra.mxu0 %vm100_vm1, %v1396_v16  ;;  %v2333_v27 = vpop.permute.xlu1 %2332 }
 0x44e   :  { %v2342_v11 = vsel %vm993_vm7, %v2333_v27, %v2335_v58  ;;  %2761 = vmatmul.mubr.msk.f32.gmra.mxu1 %vm100_vm1, %v1398_v18  ;;  %2423 = vmatprep.mubr.f32.mxu0 %v2853_v9 }
 0x44f   :  { %2386 = vmatpush1.msra.mxu0 %v2342_v11  ;;  %2307 = vmatprep.mubr.f32.mxu1 %v2853_v9 }
 0x450   :  { %2387 = vmatprep.subr.mxu0 %v2341_v52 }
 0x451   :  { %v2463_v5 = vpop.permute.xlu1 %2462  ;;  %2388 = vmatpush1.msra.mxu0 %v2340_v43 }
 0x452   :  { %v2470_v28 = vsel %vm1122_vm8, %v2461_v61, %v2463_v5  ;;  %2762 = vmatmul.mubr.msk.f32.gmra.mxu1 %vm100_vm1, %v1399_v17  ;;  %2389 = vmatprep.subr.mxu0 %v2339_v59  ;;  %v2471_v47 = vsel %vm1122_vm8, %v2463_v5, %v2828_v1 }
 0x453   :  { %2390 = vmatpush1.msra.mxu0 %v2338_v15  ;;  %2513 = vmatprep.subr.mxu1 %v2471_v47 }
 0x454   :  { %2763 = vmatmul.mubr.msk.f32.vlgmr.msra.gmra.mxu0 %vm100_vm1, %v1400_v4  ;;  %2514 = vmatpush1.msra.mxu1 %v2470_v28 }
 0x455   :  { %v2453_v30 = vpop.permute.xlu1 %2452  ;;  %2515 = vmatprep.subr.mxu1 %v2469_v46  ;;  %2429 = vmatprep.mubr.f32.mxu0 %v2853_v9 }
 0x456   :  { %2516 = vmatpush1.msra.mxu1 %v2468_v62  ;;  %v2467_v8 = vsel %vm1122_vm8, %v2451_v13, %v2453_v30  ;;  %2551 = vmatprep.mubr.f32.mxu1 %v2853_v9  ;;  %v1552_v53 = vpop.permute.xlu0 %1551 }
 0x457   :  { %2517 = vmatprep.subr.mxu1 %v2467_v8 }
 0x458   :  { %2764 = vmatmul.mubr.msk.f32.gmra.mxu0 %vm100_vm1, %v1401_v39  ;;  %2518 = vmatpush1.msra.mxu1 %v2466_v29 }
 0x459   :  { %2766 = vmatmul.mubr.msk.f32.vlgmr.msra.gmra.mxu1 %vm100_vm1, %v1403_v23  ;;  %2435 = vmatprep.mubr.f32.mxu0 %v2853_v9 }
 0x45a   :  { %2557 = vmatprep.mubr.f32.mxu1 %v2853_v9 }
 0x45c   :  { %2765 = vmatmul.mubr.msk.f32.gmra.mxu0 %vm100_vm1, %v1402_v35 }
 0x45d   :  { %2767 = vmatmul.mubr.msk.f32.gmra.mxu1 %vm100_vm1, %v1404_v57 }
 0x45e   :  { %2563 = vmatprep.mubr.f32.mxu1 %v2853_v9 }
 0x461   :  { %2768 = vmatmul.mubr.msk.f32.gmra.mxu1 %vm100_vm1, %v1405_v31 }
 0x462   :  { %v1548_v51 = vpop.permute.xlu1 %1547 }
 0x466   :  { %v1556_v43 = vpop.permute.xlu1 %1555 }
 0x4e1   :  { %v1529_v45 = vpop.f32.mrf.mxu1 }
 0x4e2   :  { %v1558_v16 = vadd.f32 %v1548_v51, %v1529_v45 }
 0x4e3   :  { %v1531_v56 = vpop.f32.mrf.mxu1 }
 0x4e4   :  { %v1559_v11 = vadd.f32 %v1548_v51, %v1531_v56 }
 0x4e5   :  { %v1535_v63 = vpop.f32.mrf.mxu1 }
 0x4e6   :  { %v1560_v17 = vadd.f32 %v1552_v53, %v1535_v63 }
 0x4e7   :  { %v1537_v2 = vpop.f32.mrf.mxu1 }
 0x4e8   :  { %v1561_v15 = vadd.f32 %v1552_v53, %v1537_v2 }
 0x4e9   :  { %v1541_v7 = vpop.f32.mrf.mxu1  ;;  %v1669_v32 = vpop.f32.mrf.mxu0 }
 0x4ea   :  { %v1686_v52 = vadd.f32 %v1669_v32, %v1558_v16  ;;  %v1562_v59 = vadd.f32 %v1556_v43, %v1541_v7 }
 0x4eb   :  { %v1543_v0 = vpop.f32.mrf.mxu1  ;;  %v1671_v24 = vpop.f32.mrf.mxu0 }
 0x4ec   :  { %v1687_v4 = vadd.f32 %v1671_v24, %v1559_v11  ;;  %v1563_v8 = vadd.f32 %v1556_v43, %v1543_v0 }
 0x4ee   :  { %v1675_v33 = vpop.f32.mrf.mxu0 }
 0x4ef   :  { %v1797_v37 = vpop.f32.mrf.mxu1  ;;  %v1688_v28 = vadd.f32 %v1675_v33, %v1560_v17 }
 0x4f0   :  { %v1677_v38 = vpop.f32.mrf.mxu0  ;;  %v1814_v47 = vadd.f32 %v1797_v37, %v1686_v52 }
 0x4f1   :  { %v1799_v25 = vpop.f32.mrf.mxu1  ;;  %v1689_v29 = vadd.f32 %v1677_v38, %v1561_v15 }
 0x4f2   :  { %v1815_v30 = vadd.f32 %v1799_v25, %v1687_v4 }
 0x4f4   :  { %v1681_v12 = vpop.f32.mrf.mxu0  ;;  %v1803_v9 = vpop.f32.mrf.mxu1 }
 0x4f5   :  { %v1690_v23 = vadd.f32 %v1681_v12, %v1562_v59  ;;  %v1816_v57 = vadd.f32 %v1803_v9, %v1688_v28 }
 0x4f6   :  { %v1683_v10 = vpop.f32.mrf.mxu0  ;;  %v1805_v41 = vpop.f32.mrf.mxu1 }
 0x4f7   :  { %v1817_v32 = vadd.f32 %v1805_v41, %v1689_v29  ;;  %v1691_v33 = vadd.f32 %v1683_v10, %v1563_v8 }
 0x4f8   :  { %v1809_v42 = vpop.f32.mrf.mxu1  ;;  %v1925_v60 = vpop.f32.mrf.mxu0 }
 0x4f9   :  { %v1942_v62 = vadd.f32 %v1925_v60, %v1814_v47  ;;  %v1818_v37 = vadd.f32 %v1809_v42, %v1690_v23 }
 0x4fa   :  { %v1811_v48 = vpop.f32.mrf.mxu1  ;;  %v1927_v49 = vpop.f32.mrf.mxu0 }
 0x4fb   :  { %v1943_v35 = vadd.f32 %v1927_v49, %v1815_v30  ;;  %v1819_v12 = vadd.f32 %v1811_v48, %v1691_v33 }
 0x4fc   :  { %v1931_v54 = vpop.f32.mrf.mxu0  ;;  %v2023_v20 = vpop.f32.mrf.mxu1 }
 0x4fd   :  { %v2040_v31 = vadd.f32 %v2023_v20, %v1942_v62  ;;  %v1944_v63 = vadd.f32 %v1931_v54, %v1816_v57 }
 0x4fe   :  { %v1933_v55 = vpop.f32.mrf.mxu0  ;;  %v2025_v3 = vpop.f32.mrf.mxu1 }
 0x4ff   :  { %v2041_v7 = vadd.f32 %v2025_v3, %v1943_v35  ;;  %v1945_v51 = vadd.f32 %v1933_v55, %v1817_v32 }
 0x500   :  { %v1937_v34 = vpop.f32.mrf.mxu0  ;;  %v2029_v36 = vpop.f32.mrf.mxu1 }
 0x501   :  { %v2042_v16 = vadd.f32 %v2029_v36, %v1944_v63  ;;  %v1946_v0 = vadd.f32 %v1937_v34, %v1818_v37 }
 0x502   :  { %v2031_v50 = vpop.f32.mrf.mxu1  ;;  %v1939_v13 = vpop.f32.mrf.mxu0 }
 0x503   :  { %v2043_v49 = vadd.f32 %v2031_v50, %v1945_v51  ;;  %v1947_v54 = vadd.f32 %v1939_v13, %v1819_v12 }
 0x504   :  { %v2035_v58 = vpop.f32.mrf.mxu1 }
 0x505   :  { %v2169_v19 = vpop.f32.mrf.mxu0  ;;  %v2044_v41 = vadd.f32 %v2035_v58, %v1946_v0 }
 0x506   :  { %v2037_v27 = vpop.f32.mrf.mxu1  ;;  %v2186_v24 = vadd.f32 %v2169_v19, %v2040_v31 }
 0x507   :  { %v2171_v18 = vpop.f32.mrf.mxu0  ;;  %v2045_v36 = vadd.f32 %v2037_v27, %v1947_v54 }
 0x508   :  { %v2187_v60 = vadd.f32 %v2171_v18, %v2041_v7 }
 0x509   :  { %v2175_v61 = vpop.f32.mrf.mxu0 }
 0x50a   :  { %v2297_v40 = vpop.f32.mrf.mxu1  ;;  %v2188_v9 = vadd.f32 %v2175_v61, %v2042_v16  ;;  %v2864_v16 = vmov 4  }
 0x50b   :  { %v2177_v1 = vpop.f32.mrf.mxu0  ;;  %v2314_v25 = vadd.f32 %v2297_v40, %v2186_v24  ;;  %2832 = vset.pattern.permute.xlu0 %v2864_v16  ;;  %2833 = vset.pattern.permute.xlu1 %v2864_v16 }
 0x50c   :  { %v2299_v5 = vpop.f32.mrf.mxu1  ;;  %v2189_v19 = vadd.f32 %v2177_v1, %v2043_v49 }
 0x50d   :  { %v2181_v44 = vpop.f32.mrf.mxu0  ;;  %v2315_v20 = vadd.f32 %v2299_v5, %v2187_v60 }
 0x50e   :  { %v2303_v46 = vpop.f32.mrf.mxu1  ;;  %v2190_v43 = vadd.f32 %v2181_v44, %v2044_v41 }
 0x50f   :  { %v2183_v45 = vpop.f32.mrf.mxu0  ;;  %v2316_v17 = vadd.f32 %v2303_v46, %v2188_v9 }
 0x510   :  { %v2305_v39 = vpop.f32.mrf.mxu1  ;;  %v2191_v61 = vadd.f32 %v2183_v45, %v2045_v36 }
 0x511   :  { %v2317_v34 = vadd.f32 %v2305_v39, %v2189_v19 }
 0x512   :  { %v2309_v56 = vpop.f32.mrf.mxu1 }
 0x513   :  { %v2318_v5 = vadd.f32 %v2309_v56, %v2190_v43 }
 0x514   :  { %v2425_v2 = vpop.f32.mrf.mxu0  ;;  %v2311_v38 = vpop.f32.mrf.mxu1 }
 0x515   :  { %v2442_v11 = vadd.f32 %v2425_v2, %v2314_v25  ;;  %v2319_v27 = vadd.f32 %v2311_v38, %v2191_v61 }
 0x516   :  { %v2427_v53 = vpop.f32.mrf.mxu0 }
 0x517   :  { %v2443_v10 = vadd.f32 %v2427_v53, %v2315_v20 }
 0x518   :  { %v2431_v52 = vpop.f32.mrf.mxu0 }
 0x519   :  { %v2553_v3 = vpop.f32.mrf.mxu1  ;;  %v2444_v48 = vadd.f32 %v2431_v52, %v2316_v17 }
 0x51a   :  { %v3809_v42 = vadd.f32 %v2553_v3, %v2442_v11  ;;  %v2433_v55 = vpop.f32.mrf.mxu0 }
 0x51b   :  { %v2555_v18 = vpop.f32.mrf.mxu1  ;;  %v2445_v1 = vadd.f32 %v2433_v55, %v2317_v34 }
 0x51c   :  { %v3811_v40 = vadd.f32 %v2555_v18, %v2443_v10  ;;  %v2437_v50 = vpop.f32.mrf.mxu0  ;;  %v2576_v13 = vmul.f32 %v3809_v42, %v3282_v21 }
 0x51d   :  { %v2559_v58 = vpop.f32.mrf.mxu1  ;;  %v2446_v44 = vadd.f32 %v2437_v50, %v2318_v5 }
 0x51e   :  { %v2577_v59 = vmul.f32 %v3811_v40, %v3284_v14  ;;  %v3817_v4 = vadd.f32 %v2559_v58, %v2444_v48  ;;  %v2439_v15 = vpop.f32.mrf.mxu0  ;;  %v2591_v30 = vmul.f32 %v2576_v13, %v3809_v42 }
 0x51f   :  { %v2561_v28 = vpop.f32.mrf.mxu1  ;;  %v2447_v23 = vadd.f32 %v2439_v15, %v2319_v27 }
 0x520   :  { %v2592_v47 = vmul.f32 %v2577_v59, %v3811_v40  ;;  %v3820_v46 = vadd.f32 %v2561_v28, %v2445_v1  ;;  %v2582_v62 = vadd.f32 %v2577_v59, %v2576_v13  ;;  %v2578_v8 = vmul.f32 %v3817_v4, %v3282_v21 }
 0x521   :  { %v2565_v39 = vpop.f32.mrf.mxu1  ;;  %v2865_v1 = vmov 5  }
 0x522   :  { %v2579_v29 = vmul.f32 %v3820_v46, %v3284_v14  ;;  %v3827_v35 = vadd.f32 %v2565_v39, %v2446_v44  ;;  %2583 = vadd.xlane.f32.xlu1 %v2582_v62  ;;  %v2597_v56 = vadd.f32 %v2592_v47, %v2591_v30  ;;  %v2593_v37 = vmul.f32 %v2578_v8, %v3817_v4 }
 0x523   :  { %v2567_v57 = vpop.f32.mrf.mxu1 }
 0x524   :  { %v2580_v31 = vmul.f32 %v3827_v35, %v3282_v21  ;;  %v3831_v45 = vadd.f32 %v2567_v57, %v2447_v23  ;;  %v2585_v63 = vadd.f32 %v2579_v29, %v2578_v8  ;;  %v2594_v7 = vmul.f32 %v2579_v29, %v3820_v46  ;;  %v2687_v29 = vld [vmem:[%s3890_s0 + $0x8] sm:$0xff] }
 0x526   :  { %v2581_v32 = vmul.f32 %v3831_v45, %v3284_v14  ;;  %2598 = vadd.xlane.f32.xlu1 %v2597_v56  ;;  %2586 = vadd.xlane.f32.xlu0 %v2585_v63  ;;  %v2595_v24 = vmul.f32 %v2580_v31, %v3827_v35  ;;  %v2600_v51 = vadd.f32 %v2594_v7, %v2593_v37 }
 0x528   :  { %v2596_v2 = vmul.f32 %v2581_v32, %v3831_v45  ;;  %v2588_v33 = vadd.f32 %v2581_v32, %v2580_v31 }
 0x52a   :  { %2589 = vadd.xlane.f32.xlu0 %v2588_v33  ;;  %v2603_v21 = vadd.f32 %v2596_v2, %v2595_v24  ;;  %v2689_v24 = vld [vmem:[%s3890_s0 + $0x28] sm:$0xff]  ;;  %v2690_v2 = vld [vmem:[%s3890_s0 + $0x30] sm:$0xff] }
 0x52c   :  { %2604 = vadd.xlane.f32.xlu1 %v2603_v21 }
 0x52e   :  { %2601 = vadd.xlane.f32.xlu0 %v2600_v51 }
 0x5ab   :  { %v2584_v14 = vpop.xlane.xlu1 %2583 }
 0x5ac   :  { %v2606_v60 = vmul.f32 0.0078125, %v2584_v14  ;;  %v2691_v14 = vld [vmem:[%s3890_s0 + $0x48] sm:$0xff] }
 0x5ae   :  { %v2612_v0 = vmul.f32 %v2606_v60, %v2606_v60 }
 0x5af   :  { %v2599_v25 = vpop.xlane.xlu1 %2598  ;;  %v2587_v53 = vpop.xlane.xlu0 %2586 }
 0x5b0   :  { %v2609_v12 = vmul.f32 0.0078125, %v2599_v25  ;;  %v2607_v20 = vmul.f32 0.0078125, %v2587_v53 }
 0x5b2   :  { %v2615_v38 = vsub.f32 %v2609_v12, %v2612_v0  ;;  %v2613_v19 = vmul.f32 %v2607_v20, %v2607_v20 }
 0x5b3   :  { %v2590_v49 = vpop.xlane.xlu0 %2589 }
 0x5b4   :  { %v2618_v9 = vadd.f32 1e-05, %v2615_v38  ;;  %v2608_v11 = vmul.f32 0.0078125, %v2590_v49 }
 0x5b5   :  { %v2605_v52 = vpop.xlane.xlu1 %2604 }
 0x5b6   :  { %2842 = vrsqrt.f32 %v2618_v9  ;;  %v2614_v54 = vmul.f32 %v2608_v11, %v2608_v11  ;;  %v2611_v41 = vmul.f32 0.0078125, %v2605_v52 }
 0x5b7   :  { %v2602_v3 = vpop.xlane.xlu0 %2601 }
 0x5b8   :  { %v2617_v17 = vsub.f32 %v2611_v41, %v2614_v54  ;;  %v2610_v10 = vmul.f32 0.0078125, %v2602_v3 }
 0x5ba   :  { %v2620_v55 = vadd.f32 1e-05, %v2617_v17  ;;  %v2616_v36 = vsub.f32 %v2610_v10, %v2613_v19 }
 0x5bc   :  { %v2619_v18 = vadd.f32 1e-05, %v2616_v36  ;;  %2844 = vrsqrt.f32 %v2620_v55 }
 0x5be   :  { %2846 = vrsqrt.f32 %v2619_v18 }
 0x5c3   :  { %v2843_v43 = vpop.eup %2842 }
 0x5c4   :  { %v2624_v34 = vmul.f32 %v3506_v6, %v2843_v43 }
 0x5c6   :  { %v2627_v48 = vmul.f32 %v2624_v34, %v2606_v60  ;;  %v2692_v60 = vld [vmem:[%s3890_s0 + $0x50] sm:$0xff] }
 0x5c8   :  { %2633 = vrot.lane.b32.xlu0 %v2627_v48, %s2855_s14 }
 0x5c9   :  { %v2845_v50 = vpop.eup %2844 }
 0x5ca   :  { %v2626_v5 = vmul.f32 %v3512_v26, %v2845_v50 }
 0x5cb   :  { %v2847_v61 = vpop.eup %2846 }
 0x5cc   :  { %2647 = vperm.xlu0 %2832, %v2624_v34   ;;  %v2625_v13 = vmul.f32 %v3500_v22, %v2847_v61  ;;  %v2629_v59 = vmul.f32 %v2626_v5, %v2608_v11 }
 0x5ce   :  { %v2628_v58 = vmul.f32 %v2625_v13, %v2607_v20 }
 0x5d0   :  { %2635 = vrot.lane.b32.xlu1 %v2628_v58, %s2855_s14  ;;  %2834 = vset.pattern.permute.xlu0 %v2865_v1 }
 0x5d4   :  { %2637 = vrot.lane.b32.xlu1 %v2629_v59, %s2855_s14 }
 0x5d8   :  { %2652 = vperm.xlu1 %2833, %v2625_v13  }
 0x5dc   :  { %2657 = vperm.xlu1 %2833, %v2626_v5  }
 0x5e0   :  { %2835 = vset.pattern.permute.xlu1 %v2865_v1 }
 0x63a   :  { %v2634_v27 = vpop.permute.xlu0 %2633 }
 0x63b   :  { %v2642_v15 = vsub.f32 %v3506_v6, %v2634_v27  ;;  %v2688_v6 = vld [vmem:[%s3890_s0 + $0x10] sm:$0xff] }
 0x63d   :  { %2668 = vperm.xlu0 %2834, %v2642_v15  }
 0x642   :  { %v2636_v28 = vpop.permute.xlu1 %2635 }
 0x643   :  { %v2643_v47 = vsub.f32 %v3500_v22, %v2636_v28 }
 0x645   :  { %2673 = vperm.xlu1 %2835, %v2643_v47  }
 0x646   :  { %v2638_v44 = vpop.permute.xlu1 %2637 }
 0x647   :  { %v2644_v62 = vsub.f32 %v3512_v26, %v2638_v44  ;;  %v2648_v30 = vpop.permute.xlu0 %2647 }
 0x648   :  { %v2660_v8 = vmul.f32 %v2648_v30, %v3809_v42  ;;  %v2661_v23 = vmul.f32 %v2648_v30, %v3811_v40 }
 0x649   :  { %2678 = vperm.xlu1 %2835, %v2644_v62  }
 0x653   :  { %v2653_v39 = vpop.permute.xlu1 %2652 }
 0x654   :  { %v2662_v42 = vmul.f32 %v2653_v39, %v3817_v4  ;;  %v2663_v40 = vmul.f32 %v2653_v39, %v3820_v46 }
 0x657   :  { %v2658_v63 = vpop.permute.xlu1 %2657 }
 0x658   :  { %v2664_v46 = vmul.f32 %v2658_v63, %v3827_v35  ;;  %v2665_v21 = vmul.f32 %v2658_v63, %v3831_v45 }
 0x6b8   :  { %v2669_v22 = vpop.permute.xlu0 %2668 }
 0x6b9   :  { %v2681_v57 = vadd.f32 %v2669_v22, %v2660_v8  ;;  %v2682_v31 = vadd.f32 %v2669_v22, %v2661_v23 }
 0x6bb   :  { %v2693_v56 = vadd.f32 %v2687_v29, %v2681_v57  ;;  %v2694_v26 = vadd.f32 %v2688_v6, %v2682_v31 }
 0x6bd   :  { %v2699_v32 = vmax.f32 %v2693_v56, 0.0  ;;  %v2700_v7 = vmax.f32 %v2694_v26, 0.0 }
 0x6bf   :  { %2705 = vst [vmem:[%s3895_s5] sm:$0xff] %v2699_v32  ;;  %2706 = vst [vmem:[%s3895_s5 + $0x8] sm:$0xff] %v2700_v7 }
 0x6c0   :  { %v2674_v33 = vpop.permute.xlu1 %2673 }
 0x6c1   :  { %v2683_v4 = vadd.f32 %v2674_v33, %v2662_v42  ;;  %v2684_v37 = vadd.f32 %v2674_v33, %v2663_v40 }
 0x6c3   :  { %v2695_v51 = vadd.f32 %v2689_v24, %v2683_v4  ;;  %v2696_v16 = vadd.f32 %v2690_v2, %v2684_v37 }
 0x6c4   :  { %v2679_v25 = vpop.permute.xlu1 %2678 }
 0x6c5   :  { %v2701_v53 = vmax.f32 %v2695_v51, 0.0  ;;  %v2702_v0 = vmax.f32 %v2696_v16, 0.0  ;;  %v2685_v12 = vadd.f32 %v2679_v25, %v2664_v46  ;;  %v2686_v38 = vadd.f32 %v2679_v25, %v2665_v21 }
 0x6c7   :  { %2707 = vst [vmem:[%s3895_s5 + $0x10] sm:$0xff] %v2701_v53  ;;  %2708 = vst [vmem:[%s3895_s5 + $0x18] sm:$0xff] %v2702_v0  ;;  %v2697_v35 = vadd.f32 %v2691_v14, %v2685_v12  ;;  %v2698_v45 = vadd.f32 %v2692_v60, %v2686_v38 }
 0x6c9   :  { %v2703_v49 = vmax.f32 %v2697_v35, 0.0  ;;  %v2704_v9 = vmax.f32 %v2698_v45, 0.0 }
 0x6cb   :  { %2709 = vst [vmem:[%s3895_s5 + $0x20] sm:$0xff] %v2703_v49  ;;  %2710 = vst [vmem:[%s3895_s5 + $0x28] sm:$0xff] %v2704_v9 }

</bundles_post_ra>
